<compile_context>
chip_gen: v7x
topology: tpu7x:2x2x1
jax: 0.10.0
libtpu: 0.0.40
codegen_flags: <defaults>
</compile_context>

<pallas_src>
import math
import functools

import jax
import jax.numpy as jnp
from jax.experimental import pallas as pl
from jax.experimental.pallas import tpu as pltpu


# ------------------------------ small helpers ----------------------------------

def _round_up(x, m):
    return (x + m - 1) // m * m


def _pad_to(x, shape):
    pads = [(0, s - d) for d, s in zip(x.shape, shape)]
    if not any(p[1] for p in pads):
        return x
    return jnp.pad(x, pads)


def _pad_gates_last(x, H, Hp):
    """Last axis holds 3 gate blocks of width H; zero-pad each block to Hp."""
    parts = [x[..., g * H:(g + 1) * H] for g in range(3)]
    parts = [_pad_to(p, p.shape[:-1] + (Hp,)) for p in parts]
    return jnp.concatenate(parts, axis=-1)


def _choose_tb(B, Lp, target_rows=256):
    """Batch block size: target ~256 MXU rows, keep >= 2 grid steps when possible."""
    tb = max(1, min(B, target_rows // max(Lp, 1)))
    if pl.cdiv(B, tb) < 2 and B > 1:
        tb = pl.cdiv(B, 2)
    return tb


# ------------------------------ fused GNN kernel -------------------------------

def _gnn_kernel(TB, L, H, step,
                a_in_ref, a_out_ref, h_ref,
                w_in_ref, b_in_ref, w_out_ref, b_out_ref,
                w_ih_in_ref, w_ih_out_ref, b_ih_ref,
                w_hh_ref, b_hh_ref,
                o_ref):
    """One batch block: A_in/A_out (TB,L,L), hidden (TB,L,H) -> new hidden.

    L, H here are the padded Lp / Hp.  All `step` iterations run with every
    intermediate in VMEM; row-wise math uses a (TB*L, H) 2-D view.
    """
    rows = TB * L
    mm_dt = w_in_ref.dtype

    # Hoisted loads (JAX does not CSE broadcasts; read once, reuse each step).
    a_in = a_in_ref[...]            # (TB, L, L)  matmul dtype
    a_out = a_out_ref[...]
    w_in = w_in_ref[...]            # (H, H)
    w_out = w_out_ref[...]
    w_ih_in = w_ih_in_ref[...]      # (H, 3H)
    w_ih_out = w_ih_out_ref[...]
    w_hh = w_hh_ref[...]            # (H, 3H)
    b_in = b_in_ref[...]            # (1, H)   f32
    b_out = b_out_ref[...]
    b_ih = b_ih_ref[...]            # (1, 3H)  f32 (b_iah/b_oah folded in)
    b_hh = b_hh_ref[...]

    h = h_ref[...].reshape(rows, H)             # f32, (rows, H)

    for _ in range(step):                       # static unroll (Python int)
        hm = h.astype(mm_dt)

        # linear_edge_in / linear_edge_out (bias folded in, f32 accumulation)
        ein = jnp.dot(hm, w_in, preferred_element_type=jnp.float32) + b_in
        eout = jnp.dot(hm, w_out, preferred_element_type=jnp.float32) + b_out

        # per-example A contraction (batched matmul on the MXU)
        iin = jnp.einsum('blk,bkh->blh', a_in,
                         ein.reshape(TB, L, H).astype(mm_dt),
                         preferred_element_type=jnp.float32).reshape(rows, H)
        iout = jnp.einsum('blk,bkh->blh', a_out,
                          eout.reshape(TB, L, H).astype(mm_dt),
                          preferred_element_type=jnp.float32).reshape(rows, H)

        # gi = F.linear(cat([input_in, input_out], -1), w_ih, b_ih)
        # w_ih.T pre-split -> no in-kernel concat; b_iah/b_oah already folded.
        gi = (jnp.dot(iin.astype(mm_dt), w_ih_in,
                      preferred_element_type=jnp.float32)
              + jnp.dot(iout.astype(mm_dt), w_ih_out,
                        preferred_element_type=jnp.float32)
              + b_ih)                                              # (rows, 3H)
        gh = jnp.dot(hm, w_hh, preferred_element_type=jnp.float32) + b_hh

        # GRU-style gate fusion (f32, lane-aligned slices since H % 128 == 0)
        r = jax.nn.sigmoid(gi[:, :H] + gh[:, :H])
        z = jax.nn.sigmoid(gi[:, H:2 * H] + gh[:, H:2 * H])
        n = jnp.tanh(gi[:, 2 * H:] + r * gh[:, 2 * H:])
        h = n + z * (h - n)

    o_ref[...] = h.reshape(TB, L, H)


def gnn_forward(params, A, hidden, *, step=1, matmul_dtype=jnp.bfloat16):
    """Pallas port of GNN.forward(A, hidden).

    A:      (B, L, 2L) float adjacency (in- and out-edges concatenated)
    hidden: (B, L, H)  with H == 2 * hidden_size (as set by the module)
    """
    f32 = jnp.float32
    A = jnp.asarray(A, f32)
    hidden = jnp.asarray(hidden, f32)
    B, L, H = hidden.shape
    assert A.shape == (B, L, 2 * L)

    Hp = _round_up(H, 128)          # lane-aligned feature dim
    Lp = _round_up(L, 8)            # sublane-aligned node dim
    TB = _choose_tb(B, Lp)          # examples per grid step
    Bp = _round_up(B, TB)
    nblocks = Bp // TB

    # --- weights: transpose once, fold b_iah/b_oah, pad, cast -------------------
    w_in_t = jnp.asarray(params['w_edge_in'], f32).T            # (H, H)
    w_out_t = jnp.asarray(params['w_edge_out'], f32).T          # (H, H)
    w_ih_t = jnp.asarray(params['w_ih'], f32).T                 # (2H, 3H)
    w_ih_in = w_ih_t[:H]                                        # (H, 3H)
    w_ih_out = w_ih_t[H:]                                       # (H, 3H)
    w_hh_t = jnp.asarray(params['w_hh'], f32).T                 # (H, 3H)
    b_in = jnp.asarray(params['b_edge_in'], f32)
    b_out = jnp.asarray(params['b_edge_out'], f32)
    b_hh = jnp.asarray(params['b_hh'], f32)
    b_iah = jnp.asarray(params['b_iah'], f32)
    b_oah = jnp.asarray(params['b_oah'], f32)
    # Exact fold: (x + b_iah) @ Wi + (y + b_oah) @ Wo + b_ih
    #           =  x @ Wi + y @ Wo + (b_ih + b_iah @ Wi + b_oah @ Wo)
    b_ih = jnp.asarray(params['b_ih'], f32) + b_iah @ w_ih_in + b_oah @ w_ih_out

    mm = matmul_dtype
    w_in_p = _pad_to(w_in_t, (Hp, Hp)).astype(mm)
    w_out_p = _pad_to(w_out_t, (Hp, Hp)).astype(mm)
    w_ih_in_p = _pad_to(_pad_gates_last(w_ih_in, H, Hp), (Hp, 3 * Hp)).astype(mm)
    w_ih_out_p = _pad_to(_pad_gates_last(w_ih_out, H, Hp), (Hp, 3 * Hp)).astype(mm)
    w_hh_p = _pad_to(_pad_gates_last(w_hh_t, H, Hp), (Hp, 3 * Hp)).astype(mm)
    b_in_p = _pad_to(b_in, (Hp,)).reshape(1, Hp)
    b_out_p = _pad_to(b_out, (Hp,)).reshape(1, Hp)
    b_ih_p = _pad_gates_last(b_ih, H, Hp).reshape(1, 3 * Hp)
    b_hh_p = _pad_gates_last(b_hh, H, Hp).reshape(1, 3 * Hp)

    # --- activations: split A at DMA time (lane-contiguous), pad, cast ----------
    a_in = _pad_to(A[:, :, :L], (Bp, Lp, Lp)).astype(mm)
    a_out = _pad_to(A[:, :, L:2 * L], (Bp, Lp, Lp)).astype(mm)
    h0 = _pad_to(hidden, (Bp, Lp, Hp))                           # stays f32

    kernel = functools.partial(_gnn_kernel, TB, Lp, Hp, step)
    batch_blk = lambda i: (i, 0, 0)
    const2d = lambda i: (0, 0)

    out = pl.pallas_call(
        kernel,
        out_shape=jax.ShapeDtypeStruct((Bp, Lp, Hp), jnp.float32),
        grid=(nblocks,),
        in_specs=[
            pl.BlockSpec((TB, Lp, Lp), batch_blk),     # A_in  (batch block)
            pl.BlockSpec((TB, Lp, Lp), batch_blk),     # A_out (batch block)
            pl.BlockSpec((TB, Lp, Hp), batch_blk),     # hidden (batch block)
            pl.BlockSpec((Hp, Hp), const2d),           # w_edge_in.T
            pl.BlockSpec((1, Hp), const2d),            # b_edge_in
            pl.BlockSpec((Hp, Hp), const2d),           # w_edge_out.T
            pl.BlockSpec((1, Hp), const2d),            # b_edge_out
            pl.BlockSpec((Hp, 3 * Hp), const2d),       # w_ih.T (input_in half)
            pl.BlockSpec((Hp, 3 * Hp), const2d),       # w_ih.T (input_out half)
            pl.BlockSpec((1, 3 * Hp), const2d),        # b_ih (folded)
            pl.BlockSpec((Hp, 3 * Hp), const2d),       # w_hh.T
            pl.BlockSpec((1, 3 * Hp), const2d),        # b_hh
        ],
        out_specs=pl.BlockSpec((TB, Lp, Hp), batch_blk),
        compiler_params=pltpu.CompilerParams(
            dimension_semantics=("parallel",)),
    )(a_in, a_out, h0, w_in_p, b_in_p, w_out_p, b_out_p,
      w_ih_in_p, w_ih_out_p, b_ih_p, w_hh_p, b_hh_p)

    return out[:B, :L, :H]


# ------------------------------ pure-JAX reference ------------------------------

def gnn_reference(params, A, hidden, *, step=1):
    A = jnp.asarray(A, jnp.float32)
    hidden = jnp.asarray(hidden, jnp.float32)
    B, L, H = hidden.shape
    for _ in range(step):
        ein = hidden @ params['w_edge_in'].T + params['b_edge_in']
        eout = hidden @ params['w_edge_out'].T + params['b_edge_out']
        input_in = jnp.einsum('blk,bkh->blh', A[:, :, :L], ein) + params['b_iah']
        input_out = jnp.einsum('blk,bkh->blh', A[:, :, L:2 * L], eout) + params['b_oah']
        inputs = jnp.concatenate([input_in, input_out], axis=2)
        gi = inputs @ params['w_ih'].T + params['b_ih']
        gh = hidden @ params['w_hh'].T + params['b_hh']
        i_r, i_i, i_n = gi[..., :H], gi[..., H:2 * H], gi[..., 2 * H:3 * H]
        h_r, h_i, h_n = gh[..., :H], gh[..., H:2 * H], gh[..., 2 * H:3 * H]
        r = jax.nn.sigmoid(i_r + h_r)
        z = jax.nn.sigmoid(i_i + h_i)
        n = jnp.tanh(i_n + r * h_n)
        hidden = n + z * (hidden - n)
    return hidden


# ------------------------------ parameter init ----------------------------------

def init_params(key, hidden_size):
    """uniform(-stdv, stdv), stdv = 1/sqrt(H), matching SR-GNN reset_parameters."""
    H = 2 * hidden_size               # GNN sets self.hidden_size = hidden_size * 2
    stdv = 1.0 / math.sqrt(H)
    shapes = {
        'w_ih': (3 * H, 2 * H), 'w_hh': (3 * H, H),
        'b_ih': (3 * H,), 'b_hh': (3 * H,),
        'b_iah': (H,), 'b_oah': (H,),
        'w_edge_in': (H, H), 'b_edge_in': (H,),
        'w_edge_out': (H, H), 'b_edge_out': (H,),
        # TODO(synk): linear_edge_f exists on the module but is unused in
        # forward(); it is intentionally not instantiated here.
    }
    names = sorted(shapes)
    keys = jax.random.split(key, len(names))
    return {n: jax.random.uniform(k, shapes[n], jnp.float32, -stdv, stdv)
            for n, k in zip(names, keys)}


# ------------------------------ main --------------------------------------------

if __name__ == "__main__":
    hidden_size = 16          # module arg -> internal H = 32
    H = 2 * hidden_size
    B, L = 4, 6
    step = 2

    key = jax.random.PRNGKey(0)
    kp, ka, kh = jax.random.split(key, 3)
    params = init_params(kp, hidden_size)
    A = jax.random.uniform(ka, (B, L, 2 * L), jnp.float32)
    hidden0 = jax.random.uniform(kh, (B, L, H), jnp.float32, -1.0, 1.0)

    ref = gnn_reference(params, A, hidden0, step=step)

    # Tight validation of the kernel structure with f32 MXU operands.
    out_f32 = gnn_forward(params, A, hidden0, step=step, matmul_dtype=jnp.float32)
    out_f32 = jax.block_until_ready(out_f32)
    assert out_f32.shape == (B, L, H)
    assert bool(jnp.all(jnp.isfinite(out_f32)))
    assert bool(jnp.allclose(out_f32, ref, atol=1e-4, rtol=1e-4))

    # Optimized path: bf16 MXU operands, f32 accumulation / gate math.
    out = gnn_forward(params, A, hidden0, step=step, matmul_dtype=jnp.bfloat16)
    out = jax.block_until_ready(out)
    assert out.shape == (B, L, H)
    assert bool(jnp.all(jnp.isfinite(out)))
    assert bool(jnp.allclose(out, ref, atol=1e-1, rtol=1e-2))

    print("KERNEL_OK")
</pallas_src>

<mosaic_0001>
module attributes {stable_mosaic.version = 11 : i64} {
  func.func @_gnn_kernel(%arg0: i32, %arg1: memref<2x8x8xf32, #tpu.memory_space<vmem>>, %arg2: memref<2x8x8xf32, #tpu.memory_space<vmem>>, %arg3: memref<2x8x128xf32, #tpu.memory_space<vmem>>, %arg4: memref<128x128xf32, #tpu.memory_space<vmem>>, %arg5: memref<1x128xf32, #tpu.memory_space<vmem>>, %arg6: memref<128x128xf32, #tpu.memory_space<vmem>>, %arg7: memref<1x128xf32, #tpu.memory_space<vmem>>, %arg8: memref<128x384xf32, #tpu.memory_space<vmem>>, %arg9: memref<128x384xf32, #tpu.memory_space<vmem>>, %arg10: memref<1x384xf32, #tpu.memory_space<vmem>>, %arg11: memref<128x384xf32, #tpu.memory_space<vmem>>, %arg12: memref<1x384xf32, #tpu.memory_space<vmem>>, %arg13: memref<2x8x128xf32, #tpu.memory_space<vmem>>) attributes {dimension_semantics = [#tpu.dimension_semantics<parallel>], iteration_bounds = array<i64: 2>, scalar_prefetch = 0 : i64, scratch_operands = 0 : i64, tpu.core_type = #tpu.core_type<tc>, window_params = [{transform_indices = @transform_0, window_bounds = array<i64: 2, 8, 8>}, {transform_indices = @transform_1, window_bounds = array<i64: 2, 8, 8>}, {transform_indices = @transform_2, window_bounds = array<i64: 2, 8, 128>}, {pipeline_mode = #tpu.pipeline_mode<synchronous>, transform_indices = @transform_3, window_bounds = array<i64: 128, 128>}, {pipeline_mode = #tpu.pipeline_mode<synchronous>, transform_indices = @transform_4, window_bounds = array<i64: 1, 128>}, {pipeline_mode = #tpu.pipeline_mode<synchronous>, transform_indices = @transform_5, window_bounds = array<i64: 128, 128>}, {pipeline_mode = #tpu.pipeline_mode<synchronous>, transform_indices = @transform_6, window_bounds = array<i64: 1, 128>}, {pipeline_mode = #tpu.pipeline_mode<synchronous>, transform_indices = @transform_7, window_bounds = array<i64: 128, 384>}, {pipeline_mode = #tpu.pipeline_mode<synchronous>, transform_indices = @transform_8, window_bounds = array<i64: 128, 384>}, {pipeline_mode = #tpu.pipeline_mode<synchronous>, transform_indices = @transform_9, window_bounds = array<i64: 1, 384>}, {pipeline_mode = #tpu.pipeline_mode<synchronous>, transform_indices = @transform_10, window_bounds = array<i64: 128, 384>}, {pipeline_mode = #tpu.pipeline_mode<synchronous>, transform_indices = @transform_11, window_bounds = array<i64: 1, 384>}, {transform_indices = @transform_12, window_bounds = array<i64: 2, 8, 128>}]} {
    %c0 = arith.constant 0 : index
    %c0_0 = arith.constant 0 : index
    %c0_1 = arith.constant 0 : index
    %0 = vector.load %arg1[%c0, %c0_0, %c0_1] : memref<2x8x8xf32, #tpu.memory_space<vmem>>, vector<2x8x8xf32>
    %c0_2 = arith.constant 0 : index
    %c0_3 = arith.constant 0 : index
    %c0_4 = arith.constant 0 : index
    %1 = vector.load %arg2[%c0_2, %c0_3, %c0_4] : memref<2x8x8xf32, #tpu.memory_space<vmem>>, vector<2x8x8xf32>
    %c0_5 = arith.constant 0 : index
    %c0_6 = arith.constant 0 : index
    %2 = vector.load %arg4[%c0_5, %c0_6] : memref<128x128xf32, #tpu.memory_space<vmem>>, vector<128x128xf32>
    %c0_7 = arith.constant 0 : index
    %c0_8 = arith.constant 0 : index
    %3 = vector.load %arg6[%c0_7, %c0_8] : memref<128x128xf32, #tpu.memory_space<vmem>>, vector<128x128xf32>
    %c0_9 = arith.constant 0 : index
    %c0_10 = arith.constant 0 : index
    %4 = vector.load %arg8[%c0_9, %c0_10] : memref<128x384xf32, #tpu.memory_space<vmem>>, vector<128x384xf32>
    %c0_11 = arith.constant 0 : index
    %c0_12 = arith.constant 0 : index
    %5 = vector.load %arg9[%c0_11, %c0_12] : memref<128x384xf32, #tpu.memory_space<vmem>>, vector<128x384xf32>
    %c0_13 = arith.constant 0 : index
    %c0_14 = arith.constant 0 : index
    %6 = vector.load %arg11[%c0_13, %c0_14] : memref<128x384xf32, #tpu.memory_space<vmem>>, vector<128x384xf32>
    %c0_15 = arith.constant 0 : index
    %c0_16 = arith.constant 0 : index
    %7 = vector.load %arg5[%c0_15, %c0_16] : memref<1x128xf32, #tpu.memory_space<vmem>>, vector<1x128xf32>
    %c0_17 = arith.constant 0 : index
    %c0_18 = arith.constant 0 : index
    %8 = vector.load %arg7[%c0_17, %c0_18] : memref<1x128xf32, #tpu.memory_space<vmem>>, vector<1x128xf32>
    %c0_19 = arith.constant 0 : index
    %c0_20 = arith.constant 0 : index
    %9 = vector.load %arg10[%c0_19, %c0_20] : memref<1x384xf32, #tpu.memory_space<vmem>>, vector<1x384xf32>
    %c0_21 = arith.constant 0 : index
    %c0_22 = arith.constant 0 : index
    %10 = vector.load %arg12[%c0_21, %c0_22] : memref<1x384xf32, #tpu.memory_space<vmem>>, vector<1x384xf32>
    %c0_23 = arith.constant 0 : index
    %c0_24 = arith.constant 0 : index
    %c0_25 = arith.constant 0 : index
    %11 = vector.load %arg3[%c0_23, %c0_24, %c0_25] : memref<2x8x128xf32, #tpu.memory_space<vmem>>, vector<2x8x128xf32>
    %12 = vector.shape_cast %11 : vector<2x8x128xf32> to vector<16x128xf32>
    %cst = arith.constant dense<0.000000e+00> : vector<16x128xf32>
    %13 = tpu.matmul %12, %2, %cst {dimension_numbers = #tpu.dot_dimension_numbers<[1], [0], [0], [1], [0, 0, 1, 1], [], []>} : vector<16x128xf32>, vector<128x128xf32>, vector<16x128xf32> -> vector<16x128xf32>
    %14 = vector.broadcast %7 : vector<1x128xf32> to vector<16x128xf32>
    %15 = arith.addf %13, %14 : vector<16x128xf32>
    %cst_26 = arith.constant dense<0.000000e+00> : vector<16x128xf32>
    %16 = tpu.matmul %12, %3, %cst_26 {dimension_numbers = #tpu.dot_dimension_numbers<[1], [0], [0], [1], [0, 0, 1, 1], [], []>} : vector<16x128xf32>, vector<128x128xf32>, vector<16x128xf32> -> vector<16x128xf32>
    %17 = vector.broadcast %8 : vector<1x128xf32> to vector<16x128xf32>
    %18 = arith.addf %16, %17 : vector<16x128xf32>
    %19 = vector.shape_cast %15 : vector<16x128xf32> to vector<2x8x128xf32>
    "tpu.trace_start"() <{level = 10 : i32, message = "blk,bkh->blh"}> : () -> ()
    %cst_27 = arith.constant dense<0.000000e+00> : vector<2x8x128xf32>
    %20 = tpu.matmul %0, %19, %cst_27 {dimension_numbers = #tpu.dot_dimension_numbers<[2], [1], [1], [2], [0, 0, 0, 1, 1, 2], [0], [0]>} : vector<2x8x8xf32>, vector<2x8x128xf32>, vector<2x8x128xf32> -> vector<2x8x128xf32>
    "tpu.trace_stop"() : () -> ()
    %21 = vector.shape_cast %20 : vector<2x8x128xf32> to vector<16x128xf32>
    %22 = vector.shape_cast %18 : vector<16x128xf32> to vector<2x8x128xf32>
    "tpu.trace_start"() <{level = 10 : i32, message = "blk,bkh->blh"}> : () -> ()
    %cst_28 = arith.constant dense<0.000000e+00> : vector<2x8x128xf32>
    %23 = tpu.matmul %1, %22, %cst_28 {dimension_numbers = #tpu.dot_dimension_numbers<[2], [1], [1], [2], [0, 0, 0, 1, 1, 2], [0], [0]>} : vector<2x8x8xf32>, vector<2x8x128xf32>, vector<2x8x128xf32> -> vector<2x8x128xf32>
    "tpu.trace_stop"() : () -> ()
    %24 = vector.shape_cast %23 : vector<2x8x128xf32> to vector<16x128xf32>
    %cst_29 = arith.constant dense<0.000000e+00> : vector<16x384xf32>
    %25 = tpu.matmul %21, %4, %cst_29 {dimension_numbers = #tpu.dot_dimension_numbers<[1], [0], [0], [1], [0, 0, 1, 1], [], []>} : vector<16x128xf32>, vector<128x384xf32>, vector<16x384xf32> -> vector<16x384xf32>
    %cst_30 = arith.constant dense<0.000000e+00> : vector<16x384xf32>
    %26 = tpu.matmul %24, %5, %cst_30 {dimension_numbers = #tpu.dot_dimension_numbers<[1], [0], [0], [1], [0, 0, 1, 1], [], []>} : vector<16x128xf32>, vector<128x384xf32>, vector<16x384xf32> -> vector<16x384xf32>
    %27 = arith.addf %25, %26 : vector<16x384xf32>
    %28 = vector.broadcast %9 : vector<1x384xf32> to vector<16x384xf32>
    %29 = arith.addf %27, %28 : vector<16x384xf32>
    %cst_31 = arith.constant dense<0.000000e+00> : vector<16x384xf32>
    %30 = tpu.matmul %12, %6, %cst_31 {dimension_numbers = #tpu.dot_dimension_numbers<[1], [0], [0], [1], [0, 0, 1, 1], [], []>} : vector<16x128xf32>, vector<128x384xf32>, vector<16x384xf32> -> vector<16x384xf32>
    %31 = vector.broadcast %10 : vector<1x384xf32> to vector<16x384xf32>
    %32 = arith.addf %30, %31 : vector<16x384xf32>
    %33 = vector.extract_strided_slice %29 {offsets = [0, 0], sizes = [16, 128], strides = [1, 1]} : vector<16x384xf32> to vector<16x128xf32>
    %34 = vector.extract_strided_slice %32 {offsets = [0, 0], sizes = [16, 128], strides = [1, 1]} : vector<16x384xf32> to vector<16x128xf32>
    %35 = arith.addf %33, %34 : vector<16x128xf32>
    %36 = arith.negf %35 : vector<16x128xf32>
    %37 = math.exp %36 : vector<16x128xf32>
    %cst_32 = arith.constant 1.000000e+00 : f32
    %38 = vector.broadcast %cst_32 : f32 to vector<16x128xf32>
    %39 = arith.addf %38, %37 : vector<16x128xf32>
    %40 = arith.divf %38, %39 : vector<16x128xf32>
    %41 = vector.extract_strided_slice %29 {offsets = [0, 128], sizes = [16, 128], strides = [1, 1]} : vector<16x384xf32> to vector<16x128xf32>
    %42 = vector.extract_strided_slice %32 {offsets = [0, 128], sizes = [16, 128], strides = [1, 1]} : vector<16x384xf32> to vector<16x128xf32>
    %43 = arith.addf %41, %42 : vector<16x128xf32>
    %44 = arith.negf %43 : vector<16x128xf32>
    %45 = math.exp %44 : vector<16x128xf32>
    %cst_33 = arith.constant 1.000000e+00 : f32
    %46 = vector.broadcast %cst_33 : f32 to vector<16x128xf32>
    %47 = arith.addf %46, %45 : vector<16x128xf32>
    %48 = arith.divf %46, %47 : vector<16x128xf32>
    %49 = vector.extract_strided_slice %29 {offsets = [0, 256], sizes = [16, 128], strides = [1, 1]} : vector<16x384xf32> to vector<16x128xf32>
    %50 = vector.extract_strided_slice %32 {offsets = [0, 256], sizes = [16, 128], strides = [1, 1]} : vector<16x384xf32> to vector<16x128xf32>
    %51 = arith.mulf %40, %50 : vector<16x128xf32>
    %52 = arith.addf %49, %51 : vector<16x128xf32>
    %53 = math.tanh %52 : vector<16x128xf32>
    %54 = arith.subf %12, %53 : vector<16x128xf32>
    %55 = arith.mulf %48, %54 : vector<16x128xf32>
    %56 = arith.addf %53, %55 : vector<16x128xf32>
    %cst_34 = arith.constant dense<0.000000e+00> : vector<16x128xf32>
    %57 = tpu.matmul %56, %2, %cst_34 {dimension_numbers = #tpu.dot_dimension_numbers<[1], [0], [0], [1], [0, 0, 1, 1], [], []>} : vector<16x128xf32>, vector<128x128xf32>, vector<16x128xf32> -> vector<16x128xf32>
    %58 = vector.broadcast %7 : vector<1x128xf32> to vector<16x128xf32>
    %59 = arith.addf %57, %58 : vector<16x128xf32>
    %cst_35 = arith.constant dense<0.000000e+00> : vector<16x128xf32>
    %60 = tpu.matmul %56, %3, %cst_35 {dimension_numbers = #tpu.dot_dimension_numbers<[1], [0], [0], [1], [0, 0, 1, 1], [], []>} : vector<16x128xf32>, vector<128x128xf32>, vector<16x128xf32> -> vector<16x128xf32>
    %61 = vector.broadcast %8 : vector<1x128xf32> to vector<16x128xf32>
    %62 = arith.addf %60, %61 : vector<16x128xf32>
    %63 = vector.shape_cast %59 : vector<16x128xf32> to vector<2x8x128xf32>
    "tpu.trace_start"() <{level = 10 : i32, message = "blk,bkh->blh"}> : () -> ()
    %cst_36 = arith.constant dense<0.000000e+00> : vector<2x8x128xf32>
    %64 = tpu.matmul %0, %63, %cst_36 {dimension_numbers = #tpu.dot_dimension_numbers<[2], [1], [1], [2], [0, 0, 0, 1, 1, 2], [0], [0]>} : vector<2x8x8xf32>, vector<2x8x128xf32>, vector<2x8x128xf32> -> vector<2x8x128xf32>
    "tpu.trace_stop"() : () -> ()
    %65 = vector.shape_cast %64 : vector<2x8x128xf32> to vector<16x128xf32>
    %66 = vector.shape_cast %62 : vector<16x128xf32> to vector<2x8x128xf32>
    "tpu.trace_start"() <{level = 10 : i32, message = "blk,bkh->blh"}> : () -> ()
    %cst_37 = arith.constant dense<0.000000e+00> : vector<2x8x128xf32>
    %67 = tpu.matmul %1, %66, %cst_37 {dimension_numbers = #tpu.dot_dimension_numbers<[2], [1], [1], [2], [0, 0, 0, 1, 1, 2], [0], [0]>} : vector<2x8x8xf32>, vector<2x8x128xf32>, vector<2x8x128xf32> -> vector<2x8x128xf32>
    "tpu.trace_stop"() : () -> ()
    %68 = vector.shape_cast %67 : vector<2x8x128xf32> to vector<16x128xf32>
    %cst_38 = arith.constant dense<0.000000e+00> : vector<16x384xf32>
    %69 = tpu.matmul %65, %4, %cst_38 {dimension_numbers = #tpu.dot_dimension_numbers<[1], [0], [0], [1], [0, 0, 1, 1], [], []>} : vector<16x128xf32>, vector<128x384xf32>, vector<16x384xf32> -> vector<16x384xf32>
    %cst_39 = arith.constant dense<0.000000e+00> : vector<16x384xf32>
    %70 = tpu.matmul %68, %5, %cst_39 {dimension_numbers = #tpu.dot_dimension_numbers<[1], [0], [0], [1], [0, 0, 1, 1], [], []>} : vector<16x128xf32>, vector<128x384xf32>, vector<16x384xf32> -> vector<16x384xf32>
    %71 = arith.addf %69, %70 : vector<16x384xf32>
    %72 = vector.broadcast %9 : vector<1x384xf32> to vector<16x384xf32>
    %73 = arith.addf %71, %72 : vector<16x384xf32>
    %cst_40 = arith.constant dense<0.000000e+00> : vector<16x384xf32>
    %74 = tpu.matmul %56, %6, %cst_40 {dimension_numbers = #tpu.dot_dimension_numbers<[1], [0], [0], [1], [0, 0, 1, 1], [], []>} : vector<16x128xf32>, vector<128x384xf32>, vector<16x384xf32> -> vector<16x384xf32>
    %75 = vector.broadcast %10 : vector<1x384xf32> to vector<16x384xf32>
    %76 = arith.addf %74, %75 : vector<16x384xf32>
    %77 = vector.extract_strided_slice %73 {offsets = [0, 0], sizes = [16, 128], strides = [1, 1]} : vector<16x384xf32> to vector<16x128xf32>
    %78 = vector.extract_strided_slice %76 {offsets = [0, 0], sizes = [16, 128], strides = [1, 1]} : vector<16x384xf32> to vector<16x128xf32>
    %79 = arith.addf %77, %78 : vector<16x128xf32>
    %80 = arith.negf %79 : vector<16x128xf32>
    %81 = math.exp %80 : vector<16x128xf32>
    %cst_41 = arith.constant 1.000000e+00 : f32
    %82 = vector.broadcast %cst_41 : f32 to vector<16x128xf32>
    %83 = arith.addf %82, %81 : vector<16x128xf32>
    %84 = arith.divf %82, %83 : vector<16x128xf32>
    %85 = vector.extract_strided_slice %73 {offsets = [0, 128], sizes = [16, 128], strides = [1, 1]} : vector<16x384xf32> to vector<16x128xf32>
    %86 = vector.extract_strided_slice %76 {offsets = [0, 128], sizes = [16, 128], strides = [1, 1]} : vector<16x384xf32> to vector<16x128xf32>
    %87 = arith.addf %85, %86 : vector<16x128xf32>
    %88 = arith.negf %87 : vector<16x128xf32>
    %89 = math.exp %88 : vector<16x128xf32>
    %cst_42 = arith.constant 1.000000e+00 : f32
    %90 = vector.broadcast %cst_42 : f32 to vector<16x128xf32>
    %91 = arith.addf %90, %89 : vector<16x128xf32>
    %92 = arith.divf %90, %91 : vector<16x128xf32>
    %93 = vector.extract_strided_slice %73 {offsets = [0, 256], sizes = [16, 128], strides = [1, 1]} : vector<16x384xf32> to vector<16x128xf32>
    %94 = vector.extract_strided_slice %76 {offsets = [0, 256], sizes = [16, 128], strides = [1, 1]} : vector<16x384xf32> to vector<16x128xf32>
    %95 = arith.mulf %84, %94 : vector<16x128xf32>
    %96 = arith.addf %93, %95 : vector<16x128xf32>
    %97 = math.tanh %96 : vector<16x128xf32>
    %98 = arith.subf %56, %97 : vector<16x128xf32>
    %99 = arith.mulf %92, %98 : vector<16x128xf32>
    %100 = arith.addf %97, %99 : vector<16x128xf32>
    %101 = vector.shape_cast %100 : vector<16x128xf32> to vector<2x8x128xf32>
    %c0_43 = arith.constant 0 : index
    %c0_44 = arith.constant 0 : index
    %c0_45 = arith.constant 0 : index
    %102 = vector.load %arg13[%c0_43, %c0_44, %c0_45] : memref<2x8x128xf32, #tpu.memory_space<vmem>>, vector<2x8x128xf32>
    tpu.vector_store %arg13[%c0_43, %c0_44, %c0_45], %101 {strides = array<i32>} : memref<2x8x128xf32, #tpu.memory_space<vmem>>, vector<2x8x128xf32>,
    return
  }
  func.func @transform_0(%arg0: i32) -> (i32, i32, i32) {
    %c0_i32 = arith.constant 0 : i32
    %c0_i32_0 = arith.constant 0 : i32
    %c0_i32_1 = arith.constant 0 : i32
    return %arg0, %c0_i32, %c0_i32_0 : i32, i32, i32
  }
  func.func @transform_1(%arg0: i32) -> (i32, i32, i32) {
    %c0_i32 = arith.constant 0 : i32
    %c0_i32_0 = arith.constant 0 : i32
    %c0_i32_1 = arith.constant 0 : i32
    return %arg0, %c0_i32, %c0_i32_0 : i32, i32, i32
  }
  func.func @transform_2(%arg0: i32) -> (i32, i32, i32) {
    %c0_i32 = arith.constant 0 : i32
    %c0_i32_0 = arith.constant 0 : i32
    %c0_i32_1 = arith.constant 0 : i32
    return %arg0, %c0_i32, %c0_i32_0 : i32, i32, i32
  }
  func.func @transform_3(%arg0: i32) -> (i32, i32) {
    %c0_i32 = arith.constant 0 : i32
    %c0_i32_0 = arith.constant 0 : i32
    %c0_i32_1 = arith.constant 0 : i32
    return %c0_i32, %c0_i32_0 : i32, i32
  }
  func.func @transform_4(%arg0: i32) -> (i32, i32) {
    %c0_i32 = arith.constant 0 : i32
    %c0_i32_0 = arith.constant 0 : i32
    %c0_i32_1 = arith.constant 0 : i32
    return %c0_i32, %c0_i32_0 : i32, i32
  }
  func.func @transform_5(%arg0: i32) -> (i32, i32) {
    %c0_i32 = arith.constant 0 : i32
    %c0_i32_0 = arith.constant 0 : i32
    %c0_i32_1 = arith.constant 0 : i32
    return %c0_i32, %c0_i32_0 : i32, i32
  }
  func.func @transform_6(%arg0: i32) -> (i32, i32) {
    %c0_i32 = arith.constant 0 : i32
    %c0_i32_0 = arith.constant 0 : i32
    %c0_i32_1 = arith.constant 0 : i32
    return %c0_i32, %c0_i32_0 : i32, i32
  }
  func.func @transform_7(%arg0: i32) -> (i32, i32) {
    %c0_i32 = arith.constant 0 : i32
    %c0_i32_0 = arith.constant 0 : i32
    %c0_i32_1 = arith.constant 0 : i32
    return %c0_i32, %c0_i32_0 : i32, i32
  }
  func.func @transform_8(%arg0: i32) -> (i32, i32) {
    %c0_i32 = arith.constant 0 : i32
    %c0_i32_0 = arith.constant 0 : i32
    %c0_i32_1 = arith.constant 0 : i32
    return %c0_i32, %c0_i32_0 : i32, i32
  }
  func.func @transform_9(%arg0: i32) -> (i32, i32) {
    %c0_i32 = arith.constant 0 : i32
    %c0_i32_0 = arith.constant 0 : i32
    %c0_i32_1 = arith.constant 0 : i32
    return %c0_i32, %c0_i32_0 : i32, i32
  }
  func.func @transform_10(%arg0: i32) -> (i32, i32) {
    %c0_i32 = arith.constant 0 : i32
    %c0_i32_0 = arith.constant 0 : i32
    %c0_i32_1 = arith.constant 0 : i32
    return %c0_i32, %c0_i32_0 : i32, i32
  }
  func.func @transform_11(%arg0: i32) -> (i32, i32) {
    %c0_i32 = arith.constant 0 : i32
    %c0_i32_0 = arith.constant 0 : i32
    %c0_i32_1 = arith.constant 0 : i32
    return %c0_i32, %c0_i32_0 : i32, i32
  }
  func.func @transform_12(%arg0: i32) -> (i32, i32, i32) {
    %c0_i32 = arith.constant 0 : i32
    %c0_i32_0 = arith.constant 0 : i32
    %c0_i32_1 = arith.constant 0 : i32
    return %arg0, %c0_i32, %c0_i32_0 : i32, i32, i32
  }
}

</mosaic_0001>

<bundles_post_ra>
// kernel: tpu_custom_call.1
= control target key start
LH: loop header
LB: loop body
LE: loop exit
PB: predicated region body
PF: predicated region fallthrough
CT: control target
= control target key end

     0   :  { %s5612_s0 = inlined_call_operand.hbm [shape: f32[4,8,8], index: 0, kind: input, shape index: {}]   ;;  %s5613_s1 = inlined_call_operand.hbm [shape: f32[4,8,8], index: 1, kind: input, shape index: {}]   ;;  %s5614_s2 = inlined_call_operand.hbm [shape: f32[4,8,128], index: 2, kind: input, shape index: {}]   ;;  %s5615_s3 = inlined_call_operand.hbm [shape: f32[128,128], index: 3, kind: input, shape index: {}]   ;;  %s5616_s4 = inlined_call_operand.vmem [shape: f32[1,128], index: 4, kind: input, shape index: {}]   ;;  %s5617_s5 = inlined_call_operand.hbm [shape: f32[128,128], index: 5, kind: input, shape index: {}]   ;;  %s5618_s6 = inlined_call_operand.vmem [shape: f32[1,128], index: 6, kind: input, shape index: {}]   ;;  %s5619_s7 = inlined_call_operand.hbm [shape: f32[128,384], index: 7, kind: input, shape index: {}]   ;;  %s5620_s8 = inlined_call_operand.hbm [shape: f32[128,384], index: 8, kind: input, shape index: {}]   ;;  %s5621_s9 = inlined_call_operand.vmem [shape: f32[1,384], index: 9, kind: input, shape index: {}]   ;;  %s5622_s10 = inlined_call_operand.hbm [shape: f32[128,384], index: 10, kind: input, shape index: {}]   ;;  %s5623_s11 = inlined_call_operand.vmem [shape: f32[1,384], index: 11, kind: input, shape index: {}]   ;;  %s5624_s12 = inlined_call_operand.hbm [shape: f32[4,8,128], index: 12, kind: output, shape index: {}]  }
   0x1   :  { %5710 = sst [smem:[#allocation72_spill]] %s5613_s1 }
   0x2   :  { %5711 = sst [smem:[#allocation73_spill]] %s5615_s3 }
   0x3   :  { %5712 = sst [smem:[#allocation74_spill]] %s5616_s4 }
   0x4   :  { %5713 = sst [smem:[#allocation75_spill]] %s5618_s6 }
   0x5   :  { %5714 = sst [smem:[#allocation76_spill]] %s5619_s7 }
   0x6   :  { %5715 = sst [smem:[#allocation77_spill]] %s5621_s9 }
   0x7   :  { %5716 = sst [smem:[#allocation78_spill]] %s5623_s11 }
   0x8   :  { %5717 = sst [smem:[#allocation79_spill]] %s5624_s12 }
   0x9   :  { %17 = vsyncpa [#allocation3], 0 }
   0xa   :  { %19 = vsyncpa [#allocation3 + $0x1], 0 }
   0xb   :  { %20 = vsyncpa [#allocation6], 0 }
   0xc   :  { %22 = vsyncpa [#allocation6 + $0x1], 0 }
   0xd   :  { %23 = vsyncpa [#allocation9], 0 }
   0xe   :  { %24 = vsyncpa [#allocation12], 0 }
   0xf   :  { %25 = vsyncpa [#allocation15], 0 }
  0x10   :  { %26 = vsyncpa [#allocation4], 0 }
  0x11   :  { %28 = vsyncpa [#allocation4 + $0x1], 0  ;;  %s4613_s21 = smov 0   ;;  %s4615_s22 = smov 0  }
  0x12   :  { %s4617_s23 = smov 0   ;;  %s4619_s24 = smov 0  }
  0x13 LB: > { %5718 = sst [smem:[#allocation23_spill]] %s4517_s21  ;;  %s4531_s25 = smov [#allocation8]   ;;  %s4529_s24 = sphi %s4619_s24, %s5853_s24   ;;  %s4525_s23 = sphi %s4617_s23, %s5857_s23   ;;  %s4521_s22 = sphi %s4615_s22, %s5856_s22   ;;  %s4517_s21 = sphi %s4613_s21, %s5855_s21  }
  0x14   : > { %5719 = sst [smem:[#allocation24_spill]] %s4529_s24  ;;  %s344_s26 = sshll.u32 %s4531_s25, 4  ;;  %s4640_s26 = int_to_ptr.vmem [resolvable:$true] %s344_s26 }
  0x15   : > { %s4634_s27 = sadd.s32 4294967295, %s4529_s24   ;;  %p2874_p0 = scmp.ge.s32.totalorder %s4529_s24, 1 }
  0x16   : > { %5720 = sst [smem:[#allocation25_spill]] %s4634_s27  ;;  %p5625_p1 = scmp.eq.s32.totalorder %s4634_s27, 0 }
  0x17   : > { %p319_p2 = scmp.eq.s32.totalorder %s4634_s27, 1  ;;  %p332_p3 = scmp.lt.s32.totalorder %s4529_s24, 3 }
  0x18   : > { %s4532_s29 = smov [#allocation11]   ;;  %s5723_s3 = sld [smem:[#allocation73_spill]] }
  0x19   : > { %p4642_p4 = pnand %p2874_p0, %p332_p3  ;;  %s376_s30 = sshll.u32 %s4532_s29, 4  ;;  %s4649_s30 = int_to_ptr.vmem [resolvable:$true] %s376_s30 }
  0x1b   : > { %s5721_s28 = scalar_select %p4642_p4, 1, 0 }
  0x1c   : > { %p4089_p6 = pneg %p4642_p4 }
  0x1e   : > { %p4653_p7 = pnand %p4089_p6, %p5625_p1  ;;  %s4217_s16 = scalar_lea.hbm %s5723_s3, 2048 }
  0x1f   : > { %p4218_p8 = scmp.ne.s32.totalorder %s5723_s3, %s4217_s16  ;;  %p4224_p12 = scmp.lt.u32.totalorder %s4217_s16, %s5723_s3 }
  0x20   : > { %s5722_s13 = scalar_select %p4653_p7, 1, 0 }
  0x21   : > { %p4665_p9 = pneg %p4653_p7 }
  0x23   : > { %s5724_s19 = scalar_select %p4665_p9, 1, 0 }
  0x24   : > { %p4220_p10 = pnand %p4665_p9, %p4218_p8 }
  0x26   : > { %p4221_p11 = pneg %p4220_p10 }
  0x28   : > { %p4226_p13 = pnand %p4224_p12, %p4221_p11 }
  0x2a   : > { %4229 = shalt.err (!%p4226_p13)
}
  0x2b   : > { %s4230_s29 = scalar_lea.vmem %s4640_s26, 2048  ;;  %p4238_p5 = scmp.lt.s32.totalorder %s4640_s26, %s4640_s26 }
  0x2c   : > { %p4231_p0 = scmp.ne.s32.totalorder %s4640_s26, %s4230_s29  ;;  %p4239_p1 = scmp.lt.s32.totalorder %s4230_s29, %s4230_s29 }
  0x2e   : > { %p4233_p3 = pnand %p4231_p0, %p4665_p9  ;;  %p4240_p8 = por %p4239_p1, %p4238_p5 }
  0x30   : > { %p4234_p6 = pneg %p4233_p3 }
  0x32   : > { %p4241_p10 = pnand %p4240_p8, %p4234_p6 }
  0x34   : > { %4244 = shalt.err (!%p4241_p10)
}
  0x35   : > { %s5632_s14 = smov 128   ;;  %s5634_s15 = smov 8  }
  0x36   : > { %4092 = dma.hbm_to_vmem [thread:$0]  (!%p4653_p7), %s5723_s3, 2048, %s4640_s26, [#allocation9], %s5632_s14, %s5632_s14, %s5634_s15  }
  0x37   : > { %s5725_s7 = sld [smem:[#allocation76_spill]] }
  0x3d   : > { %s4245_s25 = scalar_lea.hbm %s5725_s7, 6144 }
  0x3e   : > { %p4246_p1 = scmp.ne.s32.totalorder %s5725_s7, %s4245_s25  ;;  %p4252_p12 = scmp.lt.u32.totalorder %s4245_s25, %s5725_s7 }
  0x40   : > { %p4248_p5 = pnand %p4246_p1, %p4665_p9 }
  0x42   : > { %p4249_p11 = pneg %p4248_p5 }
  0x44   : > { %p4254_p13 = pnand %p4252_p12, %p4249_p11 }
  0x46   : > { %4257 = shalt.err (!%p4254_p13)
}
  0x47   : > { %s4258_s26 = scalar_lea.vmem %s4649_s30, 6144  ;;  %p4266_p8 = scmp.lt.s32.totalorder %s4649_s30, %s4649_s30 }
  0x48   : > { %p4259_p0 = scmp.ne.s32.totalorder %s4649_s30, %s4258_s26  ;;  %p4267_p10 = scmp.lt.s32.totalorder %s4258_s26, %s4258_s26 }
  0x4a   : > { %p4261_p3 = pnand %p4259_p0, %p4665_p9  ;;  %p4268_p1 = por %p4267_p10, %p4266_p8 }
  0x4c   : > { %p4262_p6 = pneg %p4261_p3 }
  0x4e   : > { %p4269_p5 = pnand %p4268_p1, %p4262_p6 }
  0x50   : > { %4272 = shalt.err (!%p4269_p5)
}
  0x51   : > { %s5628_s12 = smov 384   ;;  %s5630_s9 = smov 24  }
  0x52   : > { %4098 = dma.hbm_to_vmem [thread:$0]  (!%p4653_p7), %s5725_s7, 6144, %s4649_s30, [#allocation12], %s5628_s12, %s5628_s12, %s5630_s9  }
  0x53   : > { %s2873_s17 = sadd.s32 4294967294, %s4529_s24   ;;  %s4717_s18 = sadd.s32 1, %s4529_s24  }
  0x54   : > { %5726 = sst [smem:[#allocation26_spill]] %s4717_s18  ;;  %s41_s20 = sadd.s32 1, %s4525_s23 }
  0x55   : > { %s38_s25 = ssub.s32 %s4529_s24, %s4717_s18  ;;  %p48_p11 = scmp.ne.s32.totalorder %s4525_s23, %s4521_s22 }
  0x56   : > { %p39_p12 = scmp.eq.s32.totalorder %s38_s25, 0  ;;  %p49_p13 = scmp.eq.s32.totalorder %s4529_s24, 0 }
  0x57   : > { %p54_p0 = scmp.ne.s32.totalorder %s4521_s22, %s4517_s21  ;;  %p4729_p3 = por %p319_p2, %p48_p11 }
  0x58   : > { %s4734_s26 = scalar_select %p39_p12, %s4525_s23, %s41_s20  }
  0x59   : > { %s5727_s29 = scalar_select %p4729_p3, 1, 0 }
  0x5a   : > { %5729 = sst [smem:[#allocation28_spill]] %s4734_s26  ;;  %p50_p6 = por %p49_p13, %p48_p11 }
  0x5b   : > { %5728 = sst [smem:[#allocation27_spill]] %s5727_s29  ;;  %p5730_p8 = scmp.eq.s32.totalorder %s4634_s27, 0 }
  0x5c   : > { %p325_p1 = scmp.eq.s32.totalorder %s2873_s17, 1  ;;  %p4124_p5 = scmp.lt.s32.totalorder %s4529_s24, 2 }
  0x5d   : > { %p4738_p10 = por %p5730_p8, %p54_p0  ;;  %s5636_s11 = sand.u32 1, %s4525_s23  }
  0x5e   : > { %s4745_s16 = sshll.u32 %s4529_s24, 8  ;;  %p4747_p4 = por %p325_p1, %p54_p0 }
  0x5f   : > { %s5731_s30 = scalar_select %p4738_p10, 1, 0 }
  0x60   : > { %s5732_s25 = scalar_select %p4747_p4, 1, 0 }
  0x61   : > { %s4753_s12 = sshll.u32 %s5636_s11, 4  ;;  %p4755_p2 = pnand %p4124_p5, %p50_p6 }
  0x62   : > { %5733 = sst [smem:[#allocation29_spill]] %s5732_s25  ;;  %s443_s9 = sand.u32 1, %s4529_s24  }
  0x63   : > { %s5734_s20 = scalar_select %p4755_p2, 1, 0 }
  0x64   : > { %s5735_s1 = sld [smem:[#allocation72_spill]]  ;;  %s447_s3 = scalar_lea.vmem [#allocation5], %s4753_s12 }
  0x65   : > { %s454_s7 = sshll.u32 %s447_s3, 4  ;;  %s4537_s11 = smov [#allocation10]   ;;  %s4767_s7 = int_to_ptr.vmem [resolvable:$true] %s454_s7 }
  0x66   : > { %s4769_s26 = sshll.u32 %s4537_s11, 4  ;;  %s4771_s18 = scalar_lea.sflag [#allocation6], %s443_s9  ;;  %s361_s26 = int_to_ptr.vmem [resolvable:$true] %s4769_s26 }
  0x67   : > { %p4777_p12 = pneg %p4755_p2 }
  0x69   : > { %s5736_s14 = scalar_select %p4777_p12, 1, 0 }
  0x6a   : > { %s4764_s15 = scalar_lea.hbm %s5735_s1, %s4745_s16  ;;  %s4278_s24 = scalar_lea.hbm %s5735_s1, 512 }
  0x6b   : > { %s4273_s25 = scalar_lea.hbm %s4764_s15, 256  ;;  %p4279_p6 = scmp.lt.u32.totalorder %s4764_s15, %s5735_s1 }
  0x6c   : > { %p4274_p11 = scmp.ne.s32.totalorder %s4764_s15, %s4273_s25  ;;  %p4280_p8 = scmp.lt.u32.totalorder %s4278_s24, %s4273_s25 }
  0x6d   : > { %p4282_p5 = scmp.lt.u32.totalorder %s4273_s25, %s4764_s15 }
  0x6e   : > { %p4276_p13 = pnand %p4777_p12, %p4274_p11  ;;  %p4281_p1 = por %p4280_p8, %p4279_p6 }
  0x70   : > { %p4277_p0 = pneg %p4276_p13  ;;  %p4283_p4 = por %p4282_p5, %p4281_p1 }
  0x72   : > { %p4284_p3 = pnand %p4283_p4, %p4277_p0 }
  0x74   : > { %4287 = shalt.err (!%p4284_p3)
}
  0x75   : > { %s4288_s9 = scalar_lea.vmem %s4767_s7, 256  ;;  %s4538_s17 = smov [#allocation5]  }
  0x76   : > { %p4289_p11 = scmp.ne.s32.totalorder %s4767_s7, %s4288_s9  ;;  %s4293_s3 = sshll.u32 %s4538_s17, 4  ;;  %s4294_s3 = int_to_ptr.vmem [resolvable:$false] %s4293_s3 }
  0x77   : > { %s4295_s21 = scalar_lea.vmem %s4294_s3, 512  ;;  %p4296_p7 = scmp.lt.s32.totalorder %s4767_s7, %s4294_s3 }
  0x78   : > { %p4291_p13 = pnand %p4289_p11, %p4777_p12  ;;  %p4297_p9 = scmp.lt.s32.totalorder %s4295_s21, %s4288_s9 }
  0x7a   : > { %p4292_p10 = pneg %p4291_p13  ;;  %p4298_p6 = por %p4297_p9, %p4296_p7 }
  0x7c   : > { %p4299_p8 = pnand %p4298_p6, %p4292_p10 }
  0x7e   : > { %4302 = shalt.err (!%p4299_p8)
}
  0x7f   : > { %s5737_s24 = smov 8   ;;  %s5738_s25 = smov 128  }
  0x80   : > { %4111 = dma.hbm_to_vmem [thread:$0]  (!%p4755_p2), %s4764_s15, 256, %s4767_s7, %s4771_s18, %s5738_s25, %s5738_s25, %s5737_s24  }
  0x81   : > { %s4303_s3 = scalar_lea.hbm %s5617_s5, 2048  ;;  %p5739_p7 = scmp.ne.s32.totalorder %s5724_s19, 0 }
  0x82   : > { %p4304_p4 = scmp.ne.s32.totalorder %s5617_s5, %s4303_s3  ;;  %p4310_p10 = scmp.lt.u32.totalorder %s4303_s3, %s5617_s5 }
  0x84   : > { %p4306_p9 = pnand %p4304_p4, %p5739_p7 }
  0x86   : > { %p4307_p3 = pneg %p4306_p9 }
  0x88   : > { %p4312_p0 = pnand %p4310_p10, %p4307_p3 }
  0x8a   : > { %4315 = shalt.err (!%p4312_p0)
}
  0x8b   : > { %s4316_s6 = scalar_lea.vmem %s361_s26, 2048  ;;  %p4324_p13 = scmp.lt.s32.totalorder %s361_s26, %s361_s26 }
  0x8c   : > { %p4317_p1 = scmp.ne.s32.totalorder %s361_s26, %s4316_s6  ;;  %p4325_p6 = scmp.lt.s32.totalorder %s4316_s6, %s4316_s6 }
  0x8e   : > { %p4319_p5 = pnand %p4317_p1, %p5739_p7  ;;  %p4326_p8 = por %p4325_p6, %p4324_p13 }
  0x90   : > { %p4320_p11 = pneg %p4319_p5 }
  0x92   : > { %p4327_p2 = pnand %p4326_p8, %p4320_p11 }
  0x94   : > { %4330 = shalt.err (!%p4327_p2)
}
  0x95   : > { %p5740_p4 = scmp.ne.s32.totalorder %s5722_s13, 0  ;;  %s4539_s15 = smov [#allocation13]  }
  0x96   : > { %s389_s29 = sshll.u32 %s4539_s15, 4  ;;  %s4540_s11 = smov [#allocation14]   ;;  %s390_s29 = int_to_ptr.vmem [resolvable:$true] %s389_s29 }
  0x97   : > { %4095 = dma.hbm_to_vmem [thread:$0]  (!%p5740_p4), %s5617_s5, 2048, %s361_s26, [#allocation9], %s5738_s25, %s5738_s25, %s5737_s24  }
  0x98   : > { %s405_s17 = sshll.u32 %s4540_s11, 4  ;;  %s4331_s9 = scalar_lea.hbm %s5620_s8, 6144  ;;  %s406_s17 = int_to_ptr.vmem [resolvable:$true] %s405_s17 }
  0x99   : > { %p4332_p2 = scmp.ne.s32.totalorder %s5620_s8, %s4331_s9  ;;  %p4338_p10 = scmp.lt.u32.totalorder %s4331_s9, %s5620_s8 }
  0x9b   : > { %p4334_p9 = pnand %p4332_p2, %p5739_p7 }
  0x9d   : > { %p4335_p3 = pneg %p4334_p9 }
  0x9f   : > { %p4340_p0 = pnand %p4338_p10, %p4335_p3 }
  0xa1   : > { %4343 = shalt.err (!%p4340_p0)
}
  0xa2   : > { %s4344_s26 = scalar_lea.vmem %s390_s29, 6144  ;;  %p4352_p13 = scmp.lt.s32.totalorder %s390_s29, %s390_s29 }
  0xa3   : > { %p4345_p1 = scmp.ne.s32.totalorder %s390_s29, %s4344_s26  ;;  %p4353_p6 = scmp.lt.s32.totalorder %s4344_s26, %s4344_s26 }
  0xa5   : > { %p4347_p5 = pnand %p4345_p1, %p5739_p7  ;;  %p4354_p8 = por %p4353_p6, %p4352_p13 }
  0xa7   : > { %p4348_p11 = pneg %p4347_p5 }
  0xa9   : > { %p4355_p12 = pnand %p4354_p8, %p4348_p11 }
  0xab   : > { %4358 = shalt.err (!%p4355_p12)
}
  0xac   : > { %s5741_s4 = smov 24   ;;  %s5742_s7 = smov 384  }
  0xad   : > { %4101 = dma.hbm_to_vmem [thread:$0]  (!%p5740_p4), %s5620_s8, 6144, %s390_s29, [#allocation12], %s5742_s7, %s5742_s7, %s5741_s4  }
  0xae   : > { %s4359_s6 = scalar_lea.hbm %s5622_s10, 6144 }
  0xaf   : > { %p4360_p2 = scmp.ne.s32.totalorder %s5622_s10, %s4359_s6  ;;  %p4366_p3 = scmp.lt.u32.totalorder %s4359_s6, %s5622_s10 }
  0xb1   : > { %p4362_p12 = pnand %p4360_p2, %p5739_p7 }
  0xb3   : > { %p4363_p9 = pneg %p4362_p12 }
  0xb5   : > { %p4368_p10 = pnand %p4366_p3, %p4363_p9 }
  0xb7   : > { %4371 = shalt.err (!%p4368_p10)
}
  0xb8   : > { %s4372_s27 = scalar_lea.vmem %s406_s17, 6144  ;;  %p4380_p11 = scmp.lt.s32.totalorder %s406_s17, %s406_s17 }
  0xb9   : > { %p4373_p0 = scmp.ne.s32.totalorder %s406_s17, %s4372_s27  ;;  %p4381_p13 = scmp.lt.s32.totalorder %s4372_s27, %s4372_s27 }
  0xbb   : > { %p4375_p1 = pnand %p4373_p0, %p5739_p7  ;;  %p4382_p6 = por %p4381_p13, %p4380_p11 }
  0xbd   : > { %p4376_p5 = pneg %p4375_p1 }
  0xbf   : > { %p4383_p8 = pnand %p4382_p6, %p4376_p5 }
  0xc1   : > { %4386 = shalt.err (!%p4383_p8)
}
  0xc2   : > { %4104 = dma.hbm_to_vmem [thread:$0]  (!%p5740_p4), %s5622_s10, 6144, %s406_s17, [#allocation15], %s5742_s7, %s5742_s7, %s5741_s4  }
  0xc3   : > { %s4872_s3 = scalar_lea.hbm %s5612_s0, %s4745_s16  ;;  %s426_s13 = scalar_lea.vmem [#allocation2], %s4753_s12 }
  0xc4   : > { %s433_s6 = sshll.u32 %s426_s13, 4  ;;  %s4881_s1 = scalar_lea.hbm %s5614_s2, %s4745_s16  ;;  %s4875_s6 = int_to_ptr.vmem [resolvable:$true] %s433_s6 }
  0xc5   : > { %s5743_s26 = sand.u32 1, %s4525_s23   ;;  %s4387_s4 = scalar_lea.hbm %s4872_s3, 256 }
  0xc6   : > { %s4885_s17 = scalar_lea.sflag [#allocation3], %s5743_s26  ;;  %p4388_p7 = scmp.ne.s32.totalorder %s4872_s3, %s4387_s4 }
  0xc7   : > { %p5744_p4 = scmp.ne.s32.totalorder %s5736_s14, 0  ;;  %s4392_s29 = scalar_lea.hbm %s5612_s0, 512 }
  0xc8   : > { %p4393_p9 = scmp.lt.u32.totalorder %s4872_s3, %s5612_s0  ;;  %p4394_p3 = scmp.lt.u32.totalorder %s4392_s29, %s4387_s4 }
  0xc9   : > { %p4390_p2 = pnand %p4388_p7, %p5744_p4  ;;  %p4396_p0 = scmp.lt.u32.totalorder %s4387_s4, %s4872_s3 }
  0xca   : > { %p4395_p10 = por %p4394_p3, %p4393_p9 }
  0xcb   : > { %p4391_p12 = pneg %p4390_p2 }
  0xcc   : > { %p4397_p1 = por %p4396_p0, %p4395_p10 }
  0xce   : > { %p4398_p5 = pnand %p4397_p1, %p4391_p12 }
  0xd0   : > { %4401 = shalt.err (!%p4398_p5)
}
  0xd1   : > { %s4402_s16 = scalar_lea.vmem %s4875_s6, 256  ;;  %s4541_s11 = smov [#allocation2]  }
  0xd2   : > { %p4403_p11 = scmp.ne.s32.totalorder %s4875_s6, %s4402_s16  ;;  %s4407_s13 = sshll.u32 %s4541_s11, 4  ;;  %s4408_s13 = int_to_ptr.vmem [resolvable:$false] %s4407_s13 }
  0xd3   : > { %s4409_s9 = scalar_lea.vmem %s4408_s13, 512  ;;  %p4410_p8 = scmp.lt.s32.totalorder %s4875_s6, %s4408_s13 }
  0xd4   : > { %p4405_p13 = pnand %p4403_p11, %p5744_p4  ;;  %p4411_p7 = scmp.lt.s32.totalorder %s4409_s9, %s4402_s16 }
  0xd6   : > { %p4406_p6 = pneg %p4405_p13  ;;  %p4412_p2 = por %p4411_p7, %p4410_p8 }
  0xd8   : > { %p4413_p9 = pnand %p4412_p2, %p4406_p6 }
  0xda   : > { %4416 = shalt.err (!%p4413_p9)
}
  0xdb   : > { %p5745_p12 = scmp.ne.s32.totalorder %s5734_s20, 0  ;;  %s468_s21 = scalar_lea.vmem [#allocation7], %s4753_s12 }
  0xdc   : > { %s475_s26 = sshll.u32 %s468_s21, 4  ;;  %s4417_s4 = scalar_lea.hbm %s4881_s1, 256  ;;  %s4913_s26 = int_to_ptr.vmem [resolvable:$true] %s475_s26 }
  0xdd   : > { %4108 = dma.hbm_to_vmem [thread:$0]  (!%p5745_p12), %s4872_s3, 256, %s4875_s6, %s4885_s17, %s5738_s25, %s5738_s25, %s5737_s24  }
  0xde   : > { %p4418_p3 = scmp.ne.s32.totalorder %s4881_s1, %s4417_s4  ;;  %s4422_s29 = scalar_lea.hbm %s5614_s2, 512 }
  0xdf   : > { %p4423_p1 = scmp.lt.u32.totalorder %s4881_s1, %s5614_s2  ;;  %p4424_p5 = scmp.lt.u32.totalorder %s4422_s29, %s4417_s4 }
  0xe0   : > { %p4420_p10 = pnand %p4418_p3, %p5744_p4  ;;  %p4426_p13 = scmp.lt.u32.totalorder %s4417_s4, %s4881_s1 }
  0xe1   : > { %p4425_p11 = por %p4424_p5, %p4423_p1 }
  0xe2   : > { %p4421_p0 = pneg %p4420_p10 }
  0xe3   : > { %p4427_p6 = por %p4426_p13, %p4425_p11 }
  0xe5   : > { %p4428_p8 = pnand %p4427_p6, %p4421_p0 }
  0xe7   : > { %4431 = shalt.err (!%p4428_p8)
}
  0xe8   : > { %s4432_s12 = scalar_lea.vmem %s4913_s26, 256  ;;  %s4542_s3 = smov [#allocation7]  }
  0xe9   : > { %p4433_p7 = scmp.ne.s32.totalorder %s4913_s26, %s4432_s12  ;;  %s4437_s6 = sshll.u32 %s4542_s3, 4  ;;  %s4438_s6 = int_to_ptr.vmem [resolvable:$false] %s4437_s6 }
  0xea   : > { %s4439_s17 = scalar_lea.vmem %s4438_s6, 512  ;;  %p4440_p3 = scmp.lt.s32.totalorder %s4913_s26, %s4438_s6 }
  0xeb   : > { %p4435_p2 = pnand %p4433_p7, %p5744_p4  ;;  %p4441_p10 = scmp.lt.s32.totalorder %s4439_s17, %s4432_s12 }
  0xed   : > { %p4436_p9 = pneg %p4435_p2  ;;  %p4442_p1 = por %p4441_p10, %p4440_p3 }
  0xef   : > { %p4443_p5 = pnand %p4442_p1, %p4436_p9 }
  0xf1   : > { %4446 = shalt.err (!%p4443_p5)
}
  0xf2   : > { %4114 = dma.hbm_to_vmem [thread:$0]  (!%p5745_p12), %s4881_s1, 256, %s4913_s26, %s4771_s18, %s5738_s25, %s5738_s25, %s5737_s24  }
  0xf3   : > { %p5746_p4 = scmp.ne.s32.totalorder %s5721_s28, 0 }
  0xf5   : > { %487 = sbr.rel (%p5746_p4) target bundleno = 1847 (0x737), region = 68 }
  0xfc   : > { %s4943_s14 = sand.u32 1, %s4521_s22   ;;  %p5747_p0 = scmp.ne.s32.totalorder %s5731_s30, 0 }
  0xfd   : > { %s4946_s16 = sshll.u32 %s4943_s14, 4  ;;  %s490_s20 = scalar_lea.sflag [#allocation3], %s4943_s14 }
  0xfe   : > { %s493_s11 = scalar_lea.vmem [#allocation2], %s4946_s16 }
  0xff   : > { %4492 = dma.done.wait (%p5747_p0), %s490_s20, 256  }
 0x100   : > { %4494 = vsyncadd (%p5747_p0), %s490_s20, 4294967040  ;;  %s5748_s18 = sld [smem:[#allocation25_spill]]  ;;  %s502_s25 = scalar_lea.vmem [#allocation5], %s4946_s16 }
 0x106   : > { %s498_s28 = sand.u32 1, %s5748_s18  }
 0x107   : > { %s499_s24 = scalar_lea.sflag [#allocation6], %s498_s28 }
 0x108   : > { %4496 = dma.done.wait (%p5747_p0), %s499_s24, 512  }
 0x109   : > { %4498 = vsyncadd (%p5747_p0), %s499_s24, 4294966784  ;;  %s4961_s1 = scalar_lea.vmem [#allocation7], %s4946_s16  ;;  %p5749_p12 = scmp.eq.s32.totalorder %s5748_s18, 0 }
 0x10b   : > { %4500 = dma.done.wait (%p5749_p12), [#allocation9], 4096   ;;  %p5750_p11 = pmov %p5749_p12 }
 0x10d   : > { %4502 = vsyncadd (%p5750_p11), [#allocation9], 4294963200  ;;  %p5751_p13 = pmov %p5750_p11 }
 0x10e   : > { %p5752_p6 = pmov %p5750_p11 }
 0x10f   : > { %4504 = dma.done.wait (%p5751_p13), [#allocation12], 12288  }
 0x110   : > { %4506 = vsyncadd (%p5752_p6), [#allocation12], 4294955008  ;;  %p5753_p8 = pmov %p5752_p6 }
 0x111   : > { %p5754_p7 = pmov %p5752_p6 }
 0x112   : > { %4508 = dma.done.wait (%p5753_p8), [#allocation15], 6144  }
 0x113   : > { %4510 = vsyncadd (%p5754_p7), [#allocation15], 4294961152  ;;  %v590_v0 = vld [vmem:[#allocation8] sm:$0xff]  ;;  %v591_v1 = vld [vmem:[#allocation8 + $0x8] sm:$0xff]  ;;  %v5656_v50 = vmov 0.0   ;;  %vm4544_vm0 = vmmov 0  }
 0x114   : > { %v606_v2 = vld [vmem:[#allocation10] sm:$0xff]  ;;  %v4975_v3 = vpack.c.bf16 %v591_v1, %v590_v0  ;;  %v607_v4 = vld [vmem:[#allocation10 + $0x8] sm:$0xff]  ;;  %v592_v5 = vld [vmem:[#allocation8 + $0x10] sm:$0xff]  ;;  %s5755_s9 = sld [smem:[#allocation74_spill]]  ;;  %s5756_s4 = sld [smem:[#allocation75_spill]]  ;;  %vm934_vm1 = vcmask 64512  }
 0x115   : > { %v593_v6 = vld [vmem:[#allocation8 + $0x18] sm:$0xff]  ;;  %v4977_v7 = vpack.c.bf16 %v607_v4, %v606_v2  ;;  %v608_v9 = vld [vmem:[#allocation10 + $0x10] sm:$0xff]  ;;  %v594_v11 = vld [vmem:[#allocation8 + $0x20] sm:$0xff]  ;;  %s5800_s29 = sld [smem:[#allocation78_spill]]  ;;  %s5801_s12 = sld [smem:[#allocation77_spill]] }
 0x116   : > { %v4979_v8 = vpack.c.bf16 %v593_v6, %v592_v5  ;;  %v609_v10 = vld [vmem:[#allocation10 + $0x18] sm:$0xff]  ;;  %3514 = vmatprep.subr.bf16.mxu0 %v4975_v3  ;;  %v595_v13 = vld [vmem:[#allocation8 + $0x28] sm:$0xff]  ;;  %v610_v14 = vld [vmem:[#allocation10 + $0x20] sm:$0xff]  ;;  %s5844_s3 = sld [smem:[#allocation27_spill]]  ;;  %s2926_s6 = sshll.u32 %s5748_s18, 8 }
 0x117   : > { %v4982_v12 = vpack.c.bf16 %v609_v10, %v608_v9  ;;  %v611_v15 = vld [vmem:[#allocation10 + $0x28] sm:$0xff]  ;;  %3516 = vmatpush3.bf16.msra.mxu0 %v4975_v3  ;;  %3546 = vmatprep.subr.bf16.mxu1 %v4977_v7  ;;  %v4988_v16 = vpack.c.bf16 %v595_v13, %v594_v11  ;;  %v596_v18 = vld [vmem:[#allocation8 + $0x30] sm:$0xff]  ;;  %v597_v19 = vld [vmem:[#allocation8 + $0x38] sm:$0xff]  ;;  %s581_s17 = scalar_lea.vmem [#allocation16], %s4946_s16  ;;  %s5845_s24 = sld [smem:[#allocation79_spill]] }
 0x118   : > { %3518 = vmatprep.subr.bf16.mxu0 %v4979_v8  ;;  %3548 = vmatpush3.bf16.msra.mxu1 %v4977_v7  ;;  %v4991_v17 = vpack.c.bf16 %v611_v15, %v610_v14  ;;  %v612_v20 = vld [vmem:[#allocation10 + $0x30] sm:$0xff]  ;;  %v613_v21 = vld [vmem:[#allocation10 + $0x38] sm:$0xff]  ;;  %v4996_v22 = vpack.c.bf16 %v597_v19, %v596_v18  ;;  %v598_v24 = vld [vmem:[#allocation8 + $0x40] sm:$0xff]  ;;  %s2709_s20 = sshll.u32 %s581_s17, 4  ;;  %s2696_s30 = scalar_lea.sflag [#allocation4], %s4943_s14  ;;  %s5568_s20 = int_to_ptr.vmem [resolvable:$true] %s2709_s20 }
 0x119   : > { %3550 = vmatprep.subr.bf16.mxu1 %v4982_v12  ;;  %v4999_v23 = vpack.c.bf16 %v613_v21, %v612_v20  ;;  %v599_v25 = vld [vmem:[#allocation8 + $0x48] sm:$0xff]  ;;  %v5002_v26 = vld [vmem:[%s4961_s1] sm:$0xff]  ;;  %v601_v32 = vld [vmem:[#allocation8 + $0x58] sm:$0xff]  ;;  %s4447_s13 = scalar_lea.vmem %s5568_s20, 256  ;;  %s4545_s16 = smov [#allocation16]  }
 0x11a   : > { %v614_v27 = vld [vmem:[#allocation10 + $0x40] sm:$0xff]  ;;  %v615_v28 = vld [vmem:[#allocation10 + $0x48] sm:$0xff]  ;;  %3155 = vmatprep.mubr.f32.mxu0 %v5002_v26  ;;  %3190 = vmatprep.mubr.f32.mxu1 %v5002_v26  ;;  %v5009_v29 = vpack.c.bf16 %v599_v25, %v598_v24  ;;  %v600_v31 = vld [vmem:[#allocation8 + $0x50] sm:$0xff]  ;;  %p4448_p2 = scmp.ne.s32.totalorder %s5568_s20, %s4447_s13  ;;  %s4451_s18 = sshll.u32 %s4545_s16, 4  ;;  %s4452_s18 = int_to_ptr.vmem [resolvable:$false] %s4451_s18 }
 0x11b   : > { %3520 = vmatpush3.bf16.msra.mxu0 %v4979_v8  ;;  %v5012_v30 = vpack.c.bf16 %v615_v28, %v614_v27  ;;  %v616_v33 = vld [vmem:[#allocation10 + $0x50] sm:$0xff]  ;;  %v617_v34 = vld [vmem:[#allocation10 + $0x58] sm:$0xff]  ;;  %v5017_v35 = vpack.c.bf16 %v601_v32, %v600_v31  ;;  %v602_v37 = vld [vmem:[#allocation8 + $0x60] sm:$0xff]  ;;  %p4454_p1 = scmp.lt.s32.totalorder %s5568_s20, %s4452_s18 }
 0x11c   : > { %3522 = vmatprep.subr.bf16.mxu0 %v4988_v16  ;;  %3552 = vmatpush3.bf16.msra.mxu1 %v4982_v12  ;;  %v5020_v36 = vpack.c.bf16 %v617_v34, %v616_v33  ;;  %v603_v38 = vld [vmem:[#allocation8 + $0x68] sm:$0xff]  ;;  %v618_v39 = vld [vmem:[#allocation10 + $0x60] sm:$0xff]  ;;  %v604_v43 = vld [vmem:[#allocation8 + $0x70] sm:$0xff]  ;;  %p5847_p9 = scmp.ne.s32.totalorder %s5844_s3, 0 }
 0x11d   : > { %3554 = vmatprep.subr.bf16.mxu1 %v4991_v17  ;;  %v619_v40 = vld [vmem:[#allocation10 + $0x68] sm:$0xff]  ;;  %v5025_v41 = vpack.c.bf16 %v603_v38, %v602_v37  ;;  %v605_v44 = vld [vmem:[#allocation8 + $0x78] sm:$0xff]  ;;  %v620_v45 = vld [vmem:[#allocation10 + $0x70] sm:$0xff] }
 0x11e   : > { %v5028_v42 = vpack.c.bf16 %v619_v40, %v618_v39  ;;  %v621_v46 = vld [vmem:[#allocation10 + $0x78] sm:$0xff]  ;;  %v5033_v47 = vpack.c.bf16 %v605_v44, %v604_v43  ;;  %v5058_v51 = vld [vmem:[%s5755_s9] ss:$0 sm:$0xff]  ;;  %v671_v58 = vld [vmem:[#allocation13 + $0x8] sm:$0xff]  ;;  %p4449_p3 = pnand %p4448_p2, %p5847_p9  ;;  %s4453_s9 = scalar_lea.vmem %s4452_s18, 512 }
 0x11f   : > { %3524 = vmatpush3.bf16.msra.mxu0 %v4988_v16  ;;  %v5036_v48 = vpack.c.bf16 %v621_v46, %v620_v45  ;;  %v5044_v49 = vld [vmem:[%s4961_s1 + $0x8] sm:$0xff]  ;;  %v5063_v53 = vld [vmem:[%s5756_s4] ss:$0 sm:$0xff]  ;;  %v672_v4 = vld [vmem:[#allocation13 + $0x10] sm:$0xff]  ;;  %p4455_p5 = scmp.lt.s32.totalorder %s4453_s9, %s4447_s13 }
 0x120   : > { %3526 = vmatprep.subr.bf16.mxu0 %v4996_v22  ;;  %3556 = vmatpush3.bf16.msra.mxu1 %v4991_v17  ;;  %v5068_v57 = vld [vmem:[%s493_s11 + $0x8] sm:$0xff]  ;;  %v674_v59 = vld [vmem:[#allocation13 + $0x20] sm:$0xff]  ;;  %v680_v10 = vld [vmem:[#allocation13 + $0x50] sm:$0xff]  ;;  %p4450_p10 = pneg %p4449_p3 }
 0x121   : > { %3558 = vmatprep.subr.bf16.mxu1 %v4999_v23  ;;  %v5073_v62 = vld [vmem:[%s493_s11] sm:$0xff]  ;;  %v673_v2 = vld [vmem:[#allocation13 + $0x18] sm:$0xff]  ;;  %v675_v5 = vld [vmem:[#allocation13 + $0x28] sm:$0xff]  ;;  %v5079_v6 = vpack.c.bf16 %v674_v59, %v671_v58  ;;  %p4456_p4 = por %p4455_p5, %p4454_p1 }
 0x122   : > { %v670_v63 = vld [vmem:[#allocation13] sm:$0xff]  ;;  %v677_v9 = vld [vmem:[#allocation13 + $0x38] sm:$0xff]  ;;  %v5095_v19 = vpack.c.bf16 %v675_v5, %v672_v4  ;;  %v676_v21 = vld [vmem:[#allocation13 + $0x30] sm:$0xff] }
 0x123   : > { %3528 = vmatpush3.bf16.msra.mxu0 %v4996_v22  ;;  %v678_v11 = vld [vmem:[#allocation13 + $0x40] sm:$0xff]  ;;  %v681_v13 = vld [vmem:[#allocation13 + $0x58] sm:$0xff]  ;;  %v5093_v18 = vpack.c.bf16 %v673_v2, %v670_v63  ;;  %v5099_v20 = vpack.c.bf16 %v680_v10, %v677_v9  ;;  %v679_v24 = vld [vmem:[#allocation13 + $0x48] sm:$0xff]  ;;  %p4457_p0 = pnand %p4456_p4, %p4450_p10 }
 0x124   : > { %3530 = vmatprep.subr.bf16.mxu0 %v5009_v29  ;;  %3560 = vmatpush3.bf16.msra.mxu1 %v4999_v23  ;;  %v5087_v14 = vld [vmem:[%s502_s25] sm:$0xff]  ;;  %v5091_v15 = vld [vmem:[%s502_s25 + $0x8] sm:$0xff]  ;;  %v5104_v25 = vpack.c.bf16 %v681_v13, %v678_v11  ;;  %v5112_v33 = vpack.c.bf16 %v679_v24, %v676_v21  ;;  %s5846_s25 = smov %s5845_s24 }
 0x125   : > { %3562 = vmatprep.subr.bf16.mxu1 %v5012_v30  ;;  %v683_v27 = vld [vmem:[#allocation13 + $0x68] sm:$0xff]  ;;  %v686_v28 = vld [vmem:[#allocation13 + $0x80] sm:$0xff]  ;;  %v684_v31 = vld [vmem:[#allocation13 + $0x70] sm:$0xff] }
 0x126   : > { %v687_v32 = vld [vmem:[#allocation13 + $0x88] sm:$0xff]  ;;  %v5116_v34 = vpack.c.bf16 %v686_v28, %v683_v27  ;;  %v682_v37 = vld [vmem:[#allocation13 + $0x60] sm:$0xff]  ;;  %v685_v38 = vld [vmem:[#allocation13 + $0x78] sm:$0xff] }
 0x127   : > { %3532 = vmatpush3.bf16.msra.mxu0 %v5009_v29  ;;  %v5119_v39 = vpack.c.bf16 %v687_v32, %v684_v31  ;;  %v689_v40 = vld [vmem:[#allocation13 + $0x98] sm:$0xff]  ;;  %v692_v43 = vld [vmem:[#allocation13 + $0xb0] sm:$0xff]  ;;  %v690_v44 = vld [vmem:[#allocation13 + $0xa0] sm:$0xff]  ;;  %v5123_v46 = vpack.c.bf16 %v685_v38, %v682_v37 }
 0x128   : > { %3534 = vmatprep.subr.bf16.mxu0 %v5017_v35  ;;  %3564 = vmatpush3.bf16.msra.mxu1 %v5012_v30  ;;  %v693_v45 = vld [vmem:[#allocation13 + $0xb8] sm:$0xff]  ;;  %v695_v58 = vld [vmem:[#allocation13 + $0xc8] sm:$0xff]  ;;  %v698_v59 = vld [vmem:[#allocation13 + $0xe0] sm:$0xff] }
 0x129   : > { %3566 = vmatprep.subr.bf16.mxu1 %v5020_v36  ;;  %v697_v2 = vld [vmem:[#allocation13 + $0xd8] sm:$0xff]  ;;  %v704_v9 = vld [vmem:[#allocation13 + $0x110] sm:$0xff]  ;;  %v702_v10 = vld [vmem:[#allocation13 + $0x100] sm:$0xff] }
 0x12a   : > { %v701_v5 = vld [vmem:[#allocation13 + $0xf8] sm:$0xff]  ;;  %v700_v24 = vld [vmem:[#allocation13 + $0xf0] sm:$0xff]  ;;  %v703_v27 = vld [vmem:[#allocation13 + $0x108] sm:$0xff] }
 0x12b   : > { %3536 = vmatpush3.bf16.msra.mxu0 %v5017_v35  ;;  %v705_v11 = vld [vmem:[#allocation13 + $0x118] sm:$0xff]  ;;  %v5147_v21 = vpack.c.bf16 %v704_v9, %v701_v5  ;;  %v707_v31 = vld [vmem:[#allocation13 + $0x128] sm:$0xff]  ;;  %v710_v32 = vld [vmem:[#allocation13 + $0x140] sm:$0xff] }
 0x12c   : > { %3538 = vmatprep.subr.bf16.mxu0 %v5025_v41  ;;  %3568 = vmatpush3.bf16.msra.mxu1 %v5020_v36  ;;  %v5150_v28 = vpack.c.bf16 %v705_v11, %v702_v10  ;;  %v708_v37 = vld [vmem:[#allocation13 + $0x130] sm:$0xff]  ;;  %v711_v38 = vld [vmem:[#allocation13 + $0x148] sm:$0xff]  ;;  %v717_v9 = vld [vmem:[#allocation13 + $0x178] sm:$0xff] }
 0x12d   : > { %3570 = vmatprep.subr.bf16.mxu1 %v5028_v42  ;;  %v623_v11 = vld [vmem:[#allocation11 + $0x8] sm:$0xff] }
 0x12f   : > { %3540 = vmatpush3.bf16.msra.mxu0 %v5025_v41 }
 0x130   : > { %3542 = vmatprep.subr.bf16.mxu0 %v5033_v47  ;;  %3572 = vmatpush3.bf16.msra.mxu1 %v5028_v42 }
 0x131   : > { %3574 = vmatprep.subr.bf16.mxu1 %v5036_v48 }
 0x133   : > { %3544 = vmatpush3.bf16.msra.mxu0 %v5033_v47 }
 0x134   : > { %3576 = vmatpush3.bf16.msra.mxu1 %v5036_v48  ;;  %3193 = vmatprep.subr.mxu0 %v5656_v50 }
 0x135   : > { %3198 = vmatprep.subr.mxu1 %v5656_v50 }
 0x136   : > { %3156 = vmatmul.mubr.f32.vlgmr.msra.gmra.mrb[0].mxu0 %v5044_v49 }
 0x137   : > { %3191 = vmatmul.mubr.f32.vlgmr.msra.gmra.mrb[0].mxu1 %v5044_v49  ;;  %3195 = vmatprep.mubr.msk.f32.mxu0 %vm4544_vm0, %v5656_v50 }
 0x138   : > { %3200 = vmatprep.mubr.msk.f32.mxu1 %vm4544_vm0, %v5656_v50 }
 0x209   : > { %v3157_v52 = vpop.f32.mrb[0].mxu0 }
 0x20a   : > { %v850_v54 = vadd.f32 %v3157_v52, %v5058_v51  ;;  %v844_v55 = vpop.f32.mrb[1].mxu0  ;;  %v3192_v56 = vpop.f32.mrb[0].mxu1  ;;  %v5127_v52 = vpack.c.bf16 %v692_v43, %v689_v40  ;;  %v5153_v40 = vpack.c.bf16 %v703_v27, %v700_v24  ;;  %v5157_v43 = vpack.c.bf16 %v710_v32, %v707_v31  ;;  %v626_v24 = vld [vmem:[#allocation11 + $0x20] sm:$0xff]  ;;  %v624_v31 = vld [vmem:[#allocation11 + $0x10] sm:$0xff]  ;;  %v627_v32 = vld [vmem:[#allocation11 + $0x28] sm:$0xff] }
 0x20b   : > { %v845_v60 = vadd.f32 %v5058_v51, %v844_v55  ;;  %v925_v61 = vpop.f32.mrb[1].mxu1  ;;  %v931_v0 = vadd.f32 %v3192_v56, %v5063_v53  ;;  %v691_v55 = vld [vmem:[#allocation13 + $0xa8] sm:$0xff]  ;;  %v5130_v56 = vpack.c.bf16 %v693_v45, %v690_v44  ;;  %v706_v44 = vld [vmem:[#allocation13 + $0x120] sm:$0xff]  ;;  %v709_v45 = vld [vmem:[#allocation13 + $0x138] sm:$0xff]  ;;  %v5179_v27 = vpack.c.bf16 %v626_v24, %v623_v11 }
 0x20c   : > { %3199 = vmatpush3.msra.mxu1 %v850_v54  ;;  %v926_v1 = vadd.f32 %v5063_v53, %v925_v61  ;;  %v688_v54 = vld [vmem:[#allocation13 + $0x90] sm:$0xff]  ;;  %v699_v61 = vld [vmem:[#allocation13 + $0xe8] sm:$0xff]  ;;  %5757 = vst [vmem:[#allocation30_spill] sm:$0xff] %v5153_v40  ;;  %5758 = vst [vmem:[#allocation31_spill] sm:$0xff] %v5157_v43 }
 0x20d   : > { %3194 = vmatpush3.msra.mxu0 %v845_v60  ;;  %3201 = vmatmul.mubr.msk.f32.vlgmr.msra.gmra.mrb[2].mxu1 %vm934_vm1, %v5068_v57  ;;  %v696_v60 = vld [vmem:[#allocation13 + $0xd0] sm:$0xff]  ;;  %v5133_v63 = vpack.c.bf16 %v691_v55, %v688_v54  ;;  %v5160_v54 = vpack.c.bf16 %v711_v38, %v708_v37  ;;  %v5163_v55 = vpack.c.bf16 %v709_v45, %v706_v44  ;;  %v622_v44 = vld [vmem:[#allocation11] sm:$0xff]  ;;  %v625_v45 = vld [vmem:[#allocation11 + $0x18] sm:$0xff] }
 0x20e   : > { %3196 = vmatmul.mubr.msk.f32.vlgmr.msra.gmra.mrb[2].mxu0 %vm934_vm1, %v5073_v62  ;;  %3203 = vmatprep.subr.mxu0 %v5656_v50  ;;  %v5140_v4 = vpack.c.bf16 %v699_v61, %v696_v60  ;;  %v712_v61 = vld [vmem:[#allocation13 + $0x150] sm:$0xff]  ;;  %5764 = vst [vmem:[#allocation37_spill] sm:$0xff] %v5179_v27  ;;  %v5183_v37 = vpack.c.bf16 %v627_v32, %v624_v31  ;;  %v633_v11 = vld [vmem:[#allocation11 + $0x58] sm:$0xff] }
 0x20f   : > { %3208 = vmatprep.subr.mxu1 %v5656_v50  ;;  %3204 = vmatpush3.msra.mxu0 %v926_v1  ;;  %v694_v1 = vld [vmem:[#allocation13 + $0xc0] sm:$0xff]  ;;  %5759 = vst [vmem:[#allocation32_spill] sm:$0xff] %v5160_v54  ;;  %5760 = vst [vmem:[#allocation33_spill] sm:$0xff] %v5163_v55  ;;  %v5190_v24 = vpack.c.bf16 %v625_v45, %v622_v44 }
 0x210   : > { %3209 = vmatpush3.msra.mxu1 %v931_v0  ;;  %3205 = vmatprep.mubr.msk.f32.mxu0 %vm4544_vm0, %v5656_v50  ;;  %v5137_v0 = vpack.c.bf16 %v698_v59, %v695_v58  ;;  %v5143_v13 = vpack.c.bf16 %v697_v2, %v694_v1  ;;  %v713_v58 = vld [vmem:[#allocation13 + $0x158] sm:$0xff]  ;;  %v716_v59 = vld [vmem:[#allocation13 + $0x170] sm:$0xff]  ;;  %v715_v1 = vld [vmem:[#allocation13 + $0x168] sm:$0xff]  ;;  %5765 = vst [vmem:[#allocation38_spill] sm:$0xff] %v5183_v37 }
 0x211   : > { %3210 = vmatprep.mubr.msk.f32.mxu1 %vm4544_vm0, %v5656_v50  ;;  %3578 = vmatprep.subr.bf16.mxu0 %v5079_v6  ;;  %v5170_v60 = vpack.c.bf16 %v716_v59, %v713_v58  ;;  %v714_v2 = vld [vmem:[#allocation13 + $0x160] sm:$0xff]  ;;  %v5172_v5 = vpack.c.bf16 %v715_v1, %v712_v61  ;;  %v629_v61 = vld [vmem:[#allocation11 + $0x38] sm:$0xff]  ;;  %5766 = vst [vmem:[#allocation39_spill] sm:$0xff] %v5190_v24 }
 0x212   : > { %3206 = vmatmul.mubr.msk.f32.vlgmr.msra.gmra.mrb[4].mxu0 %vm934_vm1, %v5087_v14  ;;  %3211 = vmatmul.mubr.msk.f32.vlgmr.msra.gmra.mrb[4].mxu1 %vm934_vm1, %v5091_v15  ;;  %v5175_v10 = vpack.c.bf16 %v717_v9, %v714_v2  ;;  %v632_v2 = vld [vmem:[#allocation11 + $0x50] sm:$0xff]  ;;  %v630_v9 = vld [vmem:[#allocation11 + $0x40] sm:$0xff] }
 0x213   : > { %3580 = vmatpush1.bf16.msra.mxu0 %v5093_v18  ;;  %3610 = vmatprep.subr.bf16.mxu1 %v5095_v19  ;;  %5761 = vst [vmem:[#allocation34_spill] sm:$0xff] %v5170_v60  ;;  %5762 = vst [vmem:[#allocation35_spill] sm:$0xff] %v5172_v5 }
 0x214   : > { %3612 = vmatpush3.bf16.msra.mxu1 %v5095_v19  ;;  %3582 = vmatprep.subr.bf16.mxu0 %v5099_v20  ;;  %5763 = vst [vmem:[#allocation36_spill] sm:$0xff] %v5175_v10 }
 0x215   : > { %3614 = vmatprep.subr.bf16.mxu1 %v5104_v25  ;;  %1291 = vmatprep.mubr.f32.mxu0 %v5656_v50  ;;  %v628_v50 = vld [vmem:[#allocation11 + $0x30] sm:$0xff] }
 0x217   : > { %3584 = vmatpush1.bf16.msra.mxu0 %v5112_v33 }
 0x218   : > { %3616 = vmatpush3.bf16.msra.mxu1 %v5104_v25  ;;  %3586 = vmatprep.subr.bf16.mxu0 %v5116_v34 }
 0x219   : > { %3618 = vmatprep.subr.bf16.mxu1 %v5119_v39 }
 0x21b   : > { %3588 = vmatpush1.bf16.msra.mxu0 %v5123_v46 }
 0x21c   : > { %3620 = vmatpush3.bf16.msra.mxu1 %v5119_v39  ;;  %3590 = vmatprep.subr.bf16.mxu0 %v5127_v52 }
 0x21d   : > { %3622 = vmatprep.subr.bf16.mxu1 %v5130_v56 }
 0x21f   : > { %3592 = vmatpush1.bf16.msra.mxu0 %v5133_v63 }
 0x220   : > { %3624 = vmatpush3.bf16.msra.mxu1 %v5130_v56  ;;  %3594 = vmatprep.subr.bf16.mxu0 %v5137_v0 }
 0x221   : > { %3626 = vmatprep.subr.bf16.mxu1 %v5140_v4 }
 0x223   : > { %3596 = vmatpush1.bf16.msra.mxu0 %v5143_v13 }
 0x224   : > { %3628 = vmatpush3.bf16.msra.mxu1 %v5140_v4  ;;  %3598 = vmatprep.subr.bf16.mxu0 %v5147_v21 }
 0x225   : > { %3630 = vmatprep.subr.bf16.mxu1 %v5150_v28 }
 0x227   : > { %3600 = vmatpush1.bf16.msra.mxu0 %v5153_v40  ;;  %v651_v40 = vld [vmem:[#allocation11 + $0xe8] sm:$0xff] }
 0x228   : > { %3632 = vmatpush3.bf16.msra.mxu1 %v5150_v28  ;;  %3602 = vmatprep.subr.bf16.mxu0 %v5157_v43 }
 0x229   : > { %3634 = vmatprep.subr.bf16.mxu1 %v5160_v54 }
 0x22b   : > { %3604 = vmatpush1.bf16.msra.mxu0 %v5163_v55  ;;  %v638_v55 = vld [vmem:[#allocation11 + $0x80] sm:$0xff] }
 0x22c   : > { %3636 = vmatpush3.bf16.msra.mxu1 %v5160_v54  ;;  %3606 = vmatprep.subr.bf16.mxu0 %v5170_v60  ;;  %v635_v60 = vld [vmem:[#allocation11 + $0x68] sm:$0xff] }
 0x22d   : > { %3638 = vmatprep.subr.bf16.mxu1 %v5175_v10  ;;  %v5201_v45 = vpack.c.bf16 %v638_v55, %v635_v60  ;;  %v640_v60 = vld [vmem:[#allocation11 + $0x90] sm:$0xff] }
 0x22f   : > { %3608 = vmatpush1.bf16.msra.mxu0 %v5172_v5  ;;  %v5192_v5 = vpack.c.bf16 %v632_v2, %v629_v61  ;;  %5769 = vst [vmem:[#allocation42_spill] sm:$0xff] %v5201_v45  ;;  %v634_v61 = vld [vmem:[#allocation11 + $0x60] sm:$0xff]  ;;  %v637_v2 = vld [vmem:[#allocation11 + $0x78] sm:$0xff] }
 0x230   : > { %3640 = vmatpush3.bf16.msra.mxu1 %v5175_v10  ;;  %3642 = vmatprep.subr.bf16.mxu0 %v5179_v27  ;;  %v631_v27 = vld [vmem:[#allocation11 + $0x48] sm:$0xff]  ;;  %v5194_v10 = vpack.c.bf16 %v633_v11, %v630_v9  ;;  %v644_v9 = vld [vmem:[#allocation11 + $0xb0] sm:$0xff]  ;;  %v642_v11 = vld [vmem:[#allocation11 + $0xa0] sm:$0xff] }
 0x231   : > { %3674 = vmatprep.subr.bf16.mxu1 %v5183_v37  ;;  %5767 = vst [vmem:[#allocation40_spill] sm:$0xff] %v5192_v5  ;;  %v5197_v44 = vpack.c.bf16 %v631_v27, %v628_v50  ;;  %v5771_v50 = vmov 0.0   ;;  %v5209_v27 = vpack.c.bf16 %v637_v2, %v634_v61 }
 0x233   : > { %5768 = vst [vmem:[#allocation41_spill] sm:$0xff] %v5197_v44  ;;  %5772 = vst [vmem:[#allocation44_spill] sm:$0xff] %v5209_v27 }
 0x2e0   : > { %v5186_v38 = vpop.f32.mrb[2].mxu1 }
 0x2e1   : > { %v5188_v58 = vpop.f32.mrb[2].mxu0  ;;  %v3202_v59 = vpop.f32.mrb[3].mxu1 }
 0x2e2   : > { %v3197_v1 = vpop.f32.mrb[3].mxu0  ;;  %v636_v59 = vld [vmem:[#allocation11 + $0x70] sm:$0xff] }
 0x2e3   : > { %v639_v1 = vld [vmem:[#allocation11 + $0x88] sm:$0xff] }
 0x2e5   : > { %v1150_v31 = vpop.f32.mrb[4].mxu0  ;;  %v1223_v32 = vpop.f32.mrb[4].mxu1 }
 0x2e6   : > { %v3207_v54 = vpop.f32.mrb[5].mxu0  ;;  %1292 = vmatmul.mubr.f32.vlgmr.msra.gmra.mrb[6].mxu0 %v1150_v31  ;;  %3245 = vmatprep.mubr.f32.mxu1 %v1150_v31  ;;  %v3212_v43 = vpop.f32.mrb[5].mxu1  ;;  %v645_v31 = vld [vmem:[#allocation11 + $0xb8] sm:$0xff] }
 0x2e7   : > { %3644 = vmatpush1.bf16.msra.mxu0 %v5190_v24  ;;  %3246 = vmatmul.mubr.f32.vlgmr.msra.gmra.mrb[6].mxu1 %v1223_v32  ;;  %v5205_v54 = vpack.c.bf16 %v639_v1, %v636_v59  ;;  %v641_v43 = vld [vmem:[#allocation11 + $0x98] sm:$0xff]  ;;  %v5216_v59 = vpack.c.bf16 %v645_v31, %v642_v11  ;;  %v647_v1 = vld [vmem:[#allocation11 + $0xc8] sm:$0xff]  ;;  %v650_v24 = vld [vmem:[#allocation11 + $0xe0] sm:$0xff] }
 0x2e8   : > { %3676 = vmatpush3.bf16.msra.mxu1 %v5183_v37  ;;  %3280 = vmatprep.mubr.f32.mxu1 %v5188_v58  ;;  %v5213_v55 = vpack.c.bf16 %v644_v9, %v641_v43  ;;  %v648_v37 = vld [vmem:[#allocation11 + $0xd0] sm:$0xff]  ;;  %v5224_v2 = vpack.c.bf16 %v650_v24, %v647_v1  ;;  %v646_v43 = vld [vmem:[#allocation11 + $0xc0] sm:$0xff]  ;;  %v649_v9 = vld [vmem:[#allocation11 + $0xd8] sm:$0xff] }
 0x2e9   : > { %3646 = vmatprep.subr.bf16.mxu0 %v5192_v5  ;;  %3678 = vmatprep.subr.bf16.mxu1 %v5194_v10  ;;  %5770 = vst [vmem:[#allocation43_spill] sm:$0xff] %v5205_v54  ;;  %v643_v5 = vld [vmem:[#allocation11 + $0xa8] sm:$0xff]  ;;  %5774 = vst [vmem:[#allocation46_spill] sm:$0xff] %v5216_v59  ;;  %v5227_v11 = vpack.c.bf16 %v651_v40, %v648_v37  ;;  %v656_v31 = vld [vmem:[#allocation11 + $0x110] sm:$0xff] }
 0x2ea   : > { %1297 = vmatprep.mubr.f32.mxu0 %v5771_v50  ;;  %5773 = vst [vmem:[#allocation45_spill] sm:$0xff] %v5213_v55  ;;  %v5220_v61 = vpack.c.bf16 %v643_v5, %v640_v60  ;;  %5776 = vst [vmem:[#allocation48_spill] sm:$0xff] %v5224_v2  ;;  %v5230_v5 = vpack.c.bf16 %v649_v9, %v646_v43  ;;  %v652_v60 = vld [vmem:[#allocation11 + $0xf0] sm:$0xff]  ;;  %v655_v1 = vld [vmem:[#allocation11 + $0x108] sm:$0xff] }
 0x2eb   : > { %3648 = vmatpush1.bf16.msra.mxu0 %v5197_v44  ;;  %5777 = vst [vmem:[#allocation49_spill] sm:$0xff] %v5227_v11  ;;  %v657_v44 = vld [vmem:[#allocation11 + $0x118] sm:$0xff]  ;;  %v659_v37 = vld [vmem:[#allocation11 + $0x128] sm:$0xff]  ;;  %v5240_v43 = vpack.c.bf16 %v655_v1, %v652_v60  ;;  %v664_v1 = vld [vmem:[#allocation11 + $0x150] sm:$0xff] }
 0x2ec   : > { %3680 = vmatpush3.bf16.msra.mxu1 %v5194_v10  ;;  %3650 = vmatprep.subr.bf16.mxu0 %v5201_v45  ;;  %5775 = vst [vmem:[#allocation47_spill] sm:$0xff] %v5220_v61  ;;  %v654_v45 = vld [vmem:[#allocation11 + $0x100] sm:$0xff]  ;;  %5778 = vst [vmem:[#allocation50_spill] sm:$0xff] %v5230_v5 }
 0x2ed   : > { %3682 = vmatprep.subr.bf16.mxu1 %v5205_v54  ;;  %1298 = vmatmul.mubr.f32.gmra.mrb[8].mxu0 %v1223_v32  ;;  %v653_v32 = vld [vmem:[#allocation11 + $0xf8] sm:$0xff]  ;;  %v5237_v40 = vpack.c.bf16 %v657_v44, %v654_v45  ;;  %5780 = vst [vmem:[#allocation52_spill] sm:$0xff] %v5240_v43 }
 0x2ee   : > { %1443 = vmatprep.mubr.f32.mxu0 %v5771_v50  ;;  %v5234_v24 = vpack.c.bf16 %v656_v31, %v653_v32  ;;  %v658_v32 = vld [vmem:[#allocation11 + $0x120] sm:$0xff]  ;;  %v661_v31 = vld [vmem:[#allocation11 + $0x138] sm:$0xff] }
 0x2ef   : > { %3652 = vmatpush1.bf16.msra.mxu0 %v5209_v27  ;;  %v660_v27 = vld [vmem:[#allocation11 + $0x130] sm:$0xff]  ;;  %v665_v45 = vld [vmem:[#allocation11 + $0x158] sm:$0xff]  ;;  %v5250_v60 = vpack.c.bf16 %v661_v31, %v658_v32  ;;  %v718_v31 = vld [vmem:[#allocation14] sm:$0xff] }
 0x2f0   : > { %3684 = vmatpush3.bf16.msra.mxu1 %v5205_v54  ;;  %3654 = vmatprep.subr.bf16.mxu0 %v5213_v55  ;;  %5779 = vst [vmem:[#allocation51_spill] sm:$0xff] %v5234_v24  ;;  %v662_v55 = vld [vmem:[#allocation11 + $0x140] sm:$0xff]  ;;  %v663_v54 = vld [vmem:[#allocation11 + $0x148] sm:$0xff] }
 0x2f1   : > { %3686 = vmatprep.subr.bf16.mxu1 %v5216_v59  ;;  %v5244_v9 = vpack.c.bf16 %v662_v55, %v659_v37  ;;  %v5247_v44 = vpack.c.bf16 %v663_v54, %v660_v27  ;;  %5783 = vst [vmem:[#allocation55_spill] sm:$0xff] %v5250_v60  ;;  %v667_v37 = vld [vmem:[#allocation11 + $0x168] sm:$0xff] }
 0x2f2   : > { %v719_v27 = vld [vmem:[#allocation14 + $0x8] sm:$0xff]  ;;  %v5260_v32 = vpack.c.bf16 %v667_v37, %v664_v1  ;;  %v726_v1 = vld [vmem:[#allocation14 + $0x40] sm:$0xff]  ;;  %v729_v37 = vld [vmem:[#allocation14 + $0x58] sm:$0xff] }
 0x2f3   : > { %3656 = vmatpush1.bf16.msra.mxu0 %v5220_v61  ;;  %5781 = vst [vmem:[#allocation53_spill] sm:$0xff] %v5244_v9  ;;  %5782 = vst [vmem:[#allocation54_spill] sm:$0xff] %v5247_v44  ;;  %v666_v61 = vld [vmem:[#allocation11 + $0x160] sm:$0xff] }
 0x2f4   : > { %3688 = vmatpush3.bf16.msra.mxu1 %v5216_v59  ;;  %3658 = vmatprep.subr.bf16.mxu0 %v5224_v2  ;;  %v668_v2 = vld [vmem:[#allocation11 + $0x170] sm:$0xff]  ;;  %v669_v59 = vld [vmem:[#allocation11 + $0x178] sm:$0xff]  ;;  %5785 = vst [vmem:[#allocation57_spill] sm:$0xff] %v5260_v32 }
 0x2f5   : > { %3690 = vmatprep.subr.bf16.mxu1 %v5227_v11  ;;  %v5254_v55 = vpack.c.bf16 %v668_v2, %v665_v45  ;;  %v5257_v54 = vpack.c.bf16 %v669_v59, %v666_v61  ;;  %v721_v45 = vld [vmem:[#allocation14 + $0x18] sm:$0xff]  ;;  %v728_v61 = vld [vmem:[#allocation14 + $0x50] sm:$0xff] }
 0x2f6   : > { %v725_v59 = vld [vmem:[#allocation14 + $0x38] sm:$0xff] }
 0x2f7   : > { %3660 = vmatpush1.bf16.msra.mxu0 %v5230_v5  ;;  %5784 = vst [vmem:[#allocation56_spill] sm:$0xff] %v5254_v55  ;;  %v720_v5 = vld [vmem:[#allocation14 + $0x10] sm:$0xff] }
 0x2f8   : > { %3692 = vmatpush3.bf16.msra.mxu1 %v5227_v11  ;;  %3662 = vmatprep.subr.bf16.mxu0 %v5234_v24  ;;  %v722_v24 = vld [vmem:[#allocation14 + $0x20] sm:$0xff]  ;;  %v723_v11 = vld [vmem:[#allocation14 + $0x28] sm:$0xff] }
 0x2f9   : > { %3694 = vmatprep.subr.bf16.mxu1 %v5237_v40  ;;  %v5264_v2 = vpack.c.bf16 %v722_v24, %v719_v27  ;;  %v5274_v24 = vpack.c.bf16 %v728_v61, %v725_v59  ;;  %v724_v27 = vld [vmem:[#allocation14 + $0x30] sm:$0xff]  ;;  %v730_v61 = vld [vmem:[#allocation14 + $0x60] sm:$0xff] }
 0x2fb   : > { %3664 = vmatpush1.bf16.msra.mxu0 %v5240_v43  ;;  %5786 = vst [vmem:[#allocation58_spill] sm:$0xff] %v5264_v2  ;;  %v5270_v43 = vpack.c.bf16 %v721_v45, %v718_v31  ;;  %5789 = vst [vmem:[#allocation61_spill] sm:$0xff] %v5274_v24  ;;  %v732_v31 = vld [vmem:[#allocation14 + $0x70] sm:$0xff]  ;;  %v735_v45 = vld [vmem:[#allocation14 + $0x88] sm:$0xff] }
 0x2fc   : > { %3696 = vmatpush3.bf16.msra.mxu1 %v5237_v40  ;;  %3666 = vmatprep.subr.bf16.mxu0 %v5244_v9  ;;  %v5267_v9 = vpack.c.bf16 %v723_v11, %v720_v5  ;;  %v5278_v11 = vpack.c.bf16 %v729_v37, %v726_v1 }
 0x2fd   : > { %3698 = vmatprep.subr.bf16.mxu1 %v5247_v44  ;;  %5788 = vst [vmem:[#allocation60_spill] sm:$0xff] %v5270_v43 }
 0x2fe   : > { %5787 = vst [vmem:[#allocation59_spill] sm:$0xff] %v5267_v9  ;;  %5790 = vst [vmem:[#allocation62_spill] sm:$0xff] %v5278_v11 }
 0x2ff   : > { %3668 = vmatpush1.bf16.msra.mxu0 %v5250_v60  ;;  %v731_v60 = vld [vmem:[#allocation14 + $0x68] sm:$0xff] }
 0x300   : > { %3700 = vmatpush3.bf16.msra.mxu1 %v5247_v44  ;;  %3670 = vmatprep.subr.bf16.mxu0 %v5254_v55  ;;  %v727_v55 = vld [vmem:[#allocation14 + $0x48] sm:$0xff]  ;;  %v734_v44 = vld [vmem:[#allocation14 + $0x80] sm:$0xff] }
 0x301   : > { %3702 = vmatprep.subr.bf16.mxu1 %v5257_v54  ;;  %v5282_v5 = vpack.c.bf16 %v727_v55, %v724_v27  ;;  %v5286_v59 = vpack.c.bf16 %v734_v44, %v731_v60  ;;  %v5292_v55 = vpack.c.bf16 %v735_v45, %v732_v31  ;;  %v738_v44 = vld [vmem:[#allocation14 + $0xa0] sm:$0xff]  ;;  %v741_v60 = vld [vmem:[#allocation14 + $0xb8] sm:$0xff]  ;;  %v736_v27 = vld [vmem:[#allocation14 + $0x90] sm:$0xff] }
 0x302   : > { %v5303_v31 = vpack.c.bf16 %v741_v60, %v738_v44  ;;  %v744_v45 = vld [vmem:[#allocation14 + $0xd0] sm:$0xff]  ;;  %v750_v60 = vld [vmem:[#allocation14 + $0x100] sm:$0xff] }
 0x303   : > { %3672 = vmatpush1.bf16.msra.mxu0 %v5260_v32  ;;  %5791 = vst [vmem:[#allocation63_spill] sm:$0xff] %v5282_v5  ;;  %5792 = vst [vmem:[#allocation64_spill] sm:$0xff] %v5286_v59  ;;  %v737_v32 = vld [vmem:[#allocation14 + $0x98] sm:$0xff] }
 0x304   : > { %3704 = vmatpush3.bf16.msra.mxu1 %v5257_v54  ;;  %3706 = vmatprep.subr.bf16.mxu0 %v5264_v2  ;;  %v733_v2 = vld [vmem:[#allocation14 + $0x78] sm:$0xff]  ;;  %5793 = vst [vmem:[#allocation65_spill] sm:$0xff] %v5292_v55 }
 0x305   : > { %3738 = vmatprep.subr.bf16.mxu1 %v5267_v9  ;;  %v5295_v1 = vpack.c.bf16 %v733_v2, %v730_v61  ;;  %v747_v61 = vld [vmem:[#allocation14 + $0xe8] sm:$0xff] }
 0x306   : > { %1444 = vmatmul.mubr.f32.vlgmr.msra.gmra.mrb[6].mxu0 %v5188_v58  ;;  %v740_v58 = vld [vmem:[#allocation14 + $0xb0] sm:$0xff]  ;;  %v5313_v44 = vpack.c.bf16 %v747_v61, %v744_v45 }
 0x307   : > { %3281 = vmatmul.mubr.f32.vlgmr.msra.gmra.mrb[6].mxu1 %v5186_v38  ;;  %3708 = vmatpush1.bf16.msra.mxu0 %v5270_v43  ;;  %5794 = vst [vmem:[#allocation66_spill] sm:$0xff] %v5295_v1  ;;  %v5299_v37 = vpack.c.bf16 %v740_v58, %v737_v32  ;;  %v743_v43 = vld [vmem:[#allocation14 + $0xc8] sm:$0xff]  ;;  %v742_v58 = vld [vmem:[#allocation14 + $0xc0] sm:$0xff]  ;;  %v756_v61 = vld [vmem:[#allocation14 + $0x130] sm:$0xff] }
 0x308   : > { %1449 = vmatprep.mubr.f32.mxu0 %v5771_v50  ;;  %3710 = vmatprep.subr.bf16.mxu0 %v5274_v24  ;;  %v739_v24 = vld [vmem:[#allocation14 + $0xa8] sm:$0xff] }
 0x309   : > { %3740 = vmatpush3.bf16.msra.mxu1 %v5267_v9  ;;  %3315 = vmatprep.mubr.f32.mxu1 %v5002_v26  ;;  %5795 = vst [vmem:[#allocation67_spill] sm:$0xff] %v5299_v37  ;;  %v5306_v2 = vpack.c.bf16 %v739_v24, %v736_v27  ;;  %v752_v9 = vld [vmem:[#allocation14 + $0x110] sm:$0xff]  ;;  %v753_v27 = vld [vmem:[#allocation14 + $0x118] sm:$0xff] }
 0x30a   : > { %1450 = vmatmul.mubr.f32.gmra.mrb[8].mxu0 %v5186_v38  ;;  %3742 = vmatprep.subr.bf16.mxu1 %v5278_v11  ;;  %v746_v38 = vld [vmem:[#allocation14 + $0xe0] sm:$0xff]  ;;  %v5323_v45 = vpack.c.bf16 %v753_v27, %v750_v60 }
 0x30b   : > { %3712 = vmatpush1.bf16.msra.mxu0 %v5282_v5  ;;  %1633 = vmatprep.mubr.f32.mxu0 %v5771_v50  ;;  %5796 = vst [vmem:[#allocation68_spill] sm:$0xff] %v5306_v2  ;;  %v5309_v32 = vpack.c.bf16 %v746_v38, %v743_v43  ;;  %v749_v5 = vld [vmem:[#allocation14 + $0xf8] sm:$0xff]  ;;  %v748_v38 = vld [vmem:[#allocation14 + $0xf0] sm:$0xff]  ;;  %v762_v27 = vld [vmem:[#allocation14 + $0x160] sm:$0xff] }
 0x30c   : > { %3714 = vmatprep.subr.bf16.mxu0 %v5286_v59  ;;  %v745_v59 = vld [vmem:[#allocation14 + $0xd8] sm:$0xff]  ;;  %v5319_v43 = vpack.c.bf16 %v752_v9, %v749_v5  ;;  %v754_v5 = vld [vmem:[#allocation14 + $0x120] sm:$0xff] }
 0x30d   : > { %3744 = vmatpush3.bf16.msra.mxu1 %v5278_v11  ;;  %5797 = vst [vmem:[#allocation69_spill] sm:$0xff] %v5309_v32  ;;  %v5316_v24 = vpack.c.bf16 %v745_v59, %v742_v58  ;;  %v758_v11 = vld [vmem:[#allocation14 + $0x140] sm:$0xff]  ;;  %v759_v58 = vld [vmem:[#allocation14 + $0x148] sm:$0xff] }
 0x30e   : > { %3746 = vmatprep.subr.bf16.mxu1 %v5292_v55  ;;  %5799 = vst [vmem:[#allocation71_spill] sm:$0xff] %v5319_v43  ;;  %v5333_v60 = vpack.c.bf16 %v759_v58, %v756_v61 }
 0x30f   : > { %3716 = vmatpush1.bf16.msra.mxu0 %v5295_v1  ;;  %5798 = vst [vmem:[#allocation70_spill] sm:$0xff] %v5316_v24  ;;  %v755_v1 = vld [vmem:[#allocation14 + $0x128] sm:$0xff] }
 0x310   : > { %3718 = vmatprep.subr.bf16.mxu0 %v5299_v37  ;;  %v751_v37 = vld [vmem:[#allocation14 + $0x108] sm:$0xff]  ;;  %v5329_v9 = vpack.c.bf16 %v758_v11, %v755_v1  ;;  %v760_v1 = vld [vmem:[#allocation14 + $0x150] sm:$0xff] }
 0x311   : > { %3748 = vmatpush3.bf16.msra.mxu1 %v5292_v55  ;;  %v5326_v59 = vpack.c.bf16 %v751_v37, %v748_v38  ;;  %v764_v55 = vld [vmem:[#allocation14 + $0x170] sm:$0xff]  ;;  %v765_v38 = vld [vmem:[#allocation14 + $0x178] sm:$0xff] }
 0x312   : > { %3750 = vmatprep.subr.bf16.mxu1 %v5303_v31 }
 0x313   : > { %3720 = vmatpush1.bf16.msra.mxu0 %v5306_v2  ;;  %v761_v2 = vld [vmem:[#allocation14 + $0x158] sm:$0xff] }
 0x314   : > { %3722 = vmatprep.subr.bf16.mxu0 %v5309_v32  ;;  %v757_v32 = vld [vmem:[#allocation14 + $0x138] sm:$0xff]  ;;  %v5339_v11 = vpack.c.bf16 %v764_v55, %v761_v2 }
 0x315   : > { %3752 = vmatpush3.bf16.msra.mxu1 %v5303_v31  ;;  %v5336_v37 = vpack.c.bf16 %v757_v32, %v754_v5 }
 0x316   : > { %3754 = vmatprep.subr.bf16.mxu1 %v5313_v44 }
 0x317   : > { %3724 = vmatpush1.bf16.msra.mxu0 %v5316_v24  ;;  %v5343_v24 = vpack.c.bf16 %v765_v38, %v762_v27 }
 0x318   : > { %3726 = vmatprep.subr.bf16.mxu0 %v5319_v43  ;;  %v763_v43 = vld [vmem:[#allocation14 + $0x168] sm:$0xff] }
 0x319   : > { %3756 = vmatpush3.bf16.msra.mxu1 %v5313_v44  ;;  %v5346_v61 = vpack.c.bf16 %v763_v43, %v760_v1 }
 0x31a   : > { %3758 = vmatprep.subr.bf16.mxu1 %v5323_v45 }
 0x31b   : > { %3728 = vmatpush1.bf16.msra.mxu0 %v5326_v59 }
 0x31c   : > { %3730 = vmatprep.subr.bf16.mxu0 %v5329_v9 }
 0x31d   : > { %3760 = vmatpush3.bf16.msra.mxu1 %v5323_v45 }
 0x31e   : > { %3762 = vmatprep.subr.bf16.mxu1 %v5333_v60 }
 0x31f   : > { %3732 = vmatpush1.bf16.msra.mxu0 %v5336_v37 }
 0x320   : > { %3734 = vmatprep.subr.bf16.mxu0 %v5339_v11 }
 0x321   : > { %3764 = vmatpush3.bf16.msra.mxu1 %v5333_v60 }
 0x322   : > { %3766 = vmatprep.subr.bf16.mxu1 %v5343_v24 }
 0x323   : > { %3736 = vmatpush1.bf16.msra.mxu0 %v5346_v61 }
 0x324   : > { %3770 = vmatprep.subr.bf16.mxu0 %v4975_v3 }
 0x325   : > { %3768 = vmatpush3.bf16.msra.mxu1 %v5343_v24 }
 0x326   : > { %1634 = vmatmul.mubr.f32.vlgmr.msra.gmra.mrb[6].mxu0 %v5002_v26  ;;  %3802 = vmatprep.subr.bf16.mxu1 %v4977_v7 }
 0x327   : > { %1639 = vmatprep.mubr.f32.mxu0 %v5771_v50  ;;  %3772 = vmatpush3.bf16.msra.mxu0 %v4975_v3 }
 0x328   : > { %3316 = vmatmul.mubr.f32.vlgmr.msra.gmra.mrb[8].mxu1 %v5044_v49  ;;  %3774 = vmatprep.subr.bf16.mxu0 %v4979_v8 }
 0x329   : > { %3804 = vmatpush3.bf16.msra.mxu1 %v4977_v7 }
 0x32a   : > { %1640 = vmatmul.mubr.f32.gmra.mrb[8].mxu0 %v5044_v49  ;;  %3806 = vmatprep.subr.bf16.mxu1 %v4982_v12 }
 0x32b   : > { %3776 = vmatpush3.bf16.msra.mxu0 %v4979_v8  ;;  %v1532_v8 = vlaneseq }
 0x32c   : > { %3778 = vmatprep.subr.bf16.mxu0 %v4988_v16 }
 0x32d   : > { %3808 = vmatpush3.bf16.msra.mxu1 %v4982_v12  ;;  %v1533_v12 = vshrl.u32 %v1532_v8, 7 }
 0x32e   : > { %3810 = vmatprep.subr.bf16.mxu1 %v4991_v17 }
 0x32f   : > { %3780 = vmatpush3.bf16.msra.mxu0 %v4988_v16  ;;  %v1534_v16 = vsub.s32 0, %v1533_v12 }
 0x330   : > { %3782 = vmatprep.subr.bf16.mxu0 %v4996_v22 }
 0x331   : > { %3812 = vmatpush3.bf16.msra.mxu1 %v4991_v17  ;;  %v769_v17 = vld [vmem:[%s5800_s29] sm:$0x7] }
 0x332   : > { %3814 = vmatprep.subr.bf16.mxu1 %v4999_v23  ;;  %v1557_v26 = vrot.slane %v769_v17, %v1534_v16 }
 0x333   : > { %3784 = vmatpush3.bf16.msra.mxu0 %v4996_v22  ;;  %v768_v22 = vld [vmem:[%s5801_s12] sm:$0x7] }
 0x334   : > { %3786 = vmatprep.subr.bf16.mxu0 %v5009_v29 }
 0x335   : > { %3816 = vmatpush3.bf16.msra.mxu1 %v4999_v23  ;;  %v1535_v23 = vrot.slane %v768_v22, %v1534_v16 }
 0x336   : > { %3818 = vmatprep.subr.bf16.mxu1 %v5012_v30 }
 0x337   : > { %3788 = vmatpush3.bf16.msra.mxu0 %v5009_v29  ;;  %v5397_v29 = vadd.f32 %v1557_v26, %v1535_v23 }
 0x338   : > { %3790 = vmatprep.subr.bf16.mxu0 %v5017_v35 }
 0x339   : > { %3820 = vmatpush3.bf16.msra.mxu1 %v5012_v30  ;;  %v1538_v30 = vsub.s32 1, %v1533_v12 }
 0x33a   : > { %3822 = vmatprep.subr.bf16.mxu1 %v5020_v36 }
 0x33b   : > { %3792 = vmatpush3.bf16.msra.mxu0 %v5017_v35 }
 0x33c   : > { %3794 = vmatprep.subr.bf16.mxu0 %v5025_v41 }
 0x33d   : > { %3824 = vmatpush3.bf16.msra.mxu1 %v5020_v36 }
 0x33e   : > { %3826 = vmatprep.subr.bf16.mxu1 %v5028_v42 }
 0x33f   : > { %3796 = vmatpush3.bf16.msra.mxu0 %v5025_v41  ;;  %v1539_v41 = vrot.slane %v768_v22, %v1538_v30 }
 0x340   : > { %3798 = vmatprep.subr.bf16.mxu0 %v5033_v47 }
 0x341   : > { %3828 = vmatpush3.bf16.msra.mxu1 %v5028_v42  ;;  %v1561_v42 = vrot.slane %v769_v17, %v1538_v30 }
 0x342   : > { %3830 = vmatprep.subr.bf16.mxu1 %v5036_v48 }
 0x343   : > { %3800 = vmatpush3.bf16.msra.mxu0 %v5033_v47  ;;  %v5400_v43 = vadd.f32 %v1561_v42, %v1539_v41 }
 0x344   : > { %3388 = vmatprep.subr.mxu0 %v5771_v50 }
 0x345   : > { %3832 = vmatpush3.bf16.msra.mxu1 %v5036_v48 }
 0x346   : > { %3393 = vmatprep.subr.mxu1 %v5771_v50 }
 0x3da   : > { %v3282_v3 = vpop.f32.mrb[6].mxu1 }
 0x3db   : > { %v1522_v7 = vpop.f32.mrb[7].mxu1 }
 0x3f9   : > { %v1635_v35 = vpop.f32.mrb[6].mxu0 }
 0x3fa   : > { %v4026_v36 = vadd.f32 %v5397_v29, %v1635_v35  ;;  %v1637_v47 = vpop.f32.mrb[7].mxu0  ;;  %v1542_v35 = vsub.s32 2, %v1533_v12 }
 0x3fb   : > { %v3317_v48 = vpop.f32.mrb[8].mxu1  ;;  %v4028_v38 = vadd.f32 %v5400_v43, %v1637_v47 }
 0x3fc   : > { %v2906_v55 = vmul.f32 -1.442695, %v4026_v36  ;;  %v1712_v2 = vpop.f32.mrb[9].mxu1  ;;  %v5405_v41 = vrot.slane %v769_v17, %v1542_v35  ;;  %v5407_v42 = vrot.slane %v768_v22, %v1542_v35 }
 0x3fd   : > { %v1641_v32 = vpop.f32.mrb[8].mxu0  ;;  %v2908_v1 = vmul.f32 -1.442695, %v4028_v38 }
 0x3fe   : > { %4176 = vpow2.f32 %v2906_v55  ;;  %v4030_v58 = vadd.f32 %v5397_v29, %v1641_v32  ;;  %v1643_v5 = vpop.f32.mrb[9].mxu0  ;;  %v1713_v47 = vadd.f32 %v1712_v2, %v5405_v41  ;;  %v1552_v17 = vadd.f32 %v3282_v3, %v5407_v42 }
 0x3ff   : > { %v4032_v8 = vadd.f32 %v5400_v43, %v1643_v5 }
 0x400   : > { %v2907_v27 = vmul.f32 -1.442695, %v4030_v58  ;;  %v1549_v58 = vadd.f32 %v5407_v42, %v1522_v7 }
 0x401   : > { %v2909_v26 = vmul.f32 -1.442695, %v4032_v8 }
 0x402   : > { %4178 = vpow2.f32 %v2907_v27 }
 0x403   : > { %4180 = vpow2.f32 %v2908_v1  ;;  %v1718_v1 = vadd.f32 %v3317_v48, %v5405_v41 }
 0x408   : > { %v4177_v16 = vpop.eup %4176 }
 0x409   : > { %v1729_v23 = vadd.f32 1.0, %v4177_v16 }
 0x40b   : > { %4182 = vrcp.f32 %v1729_v23 }
 0x40c   : > { %v4179_v30 = vpop.eup %4178  ;;  %4184 = vpow2.f32 %v2909_v26  ;;  %v4216_v26 = vld [vmem:[%s4961_s1] sm:$0xff]  ;;  %s5566_s1 = scalar_lea.hbm %s5845_s24, %s2926_s6 }
 0x40d   : > { %v1730_v36 = vadd.f32 1.0, %v4179_v30  ;;  %v4181_v55 = vpop.eup %4180 }
 0x40e   : > { %v1743_v38 = vadd.f32 1.0, %v4181_v55 }
 0x40f   : > { %4186 = vrcp.f32 %v1730_v36 }
 0x415   : > { %v4183_v32 = vpop.eup %4182 }
 0x416   : > { %v1749_v5 = vmul.f32 %v4183_v32, %v1713_v47  ;;  %v4185_v27 = vpop.eup %4184 }
 0x417   : > { %v1744_v22 = vadd.f32 1.0, %v4185_v27 }
 0x418   : > { %v1751_v12 = vadd.f32 %v1749_v5, %v1549_v58 }
 0x419   : > { %v4187_v8 = vpop.eup %4186 }
 0x41a   : > { %v1750_v16 = vmul.f32 %v4187_v8, %v1718_v1  ;;  %4188 = vtanh.f32 %v1751_v12 }
 0x41b   : > { %4190 = vrcp.f32 %v1743_v38 }
 0x41c   : > { %v1752_v23 = vadd.f32 %v1750_v16, %v1552_v17  ;;  %v5817_v17 = vld [vmem:[#allocation45_spill] sm:$0xff]  ;;  %v5818_v16 = vld [vmem:[#allocation46_spill] sm:$0xff] }
 0x41e   : > { %4192 = vtanh.f32 %v1752_v23  ;;  %v5821_v23 = vld [vmem:[#allocation49_spill] sm:$0xff] }
 0x41f   : > { %4194 = vrcp.f32 %v1744_v22  ;;  %v5819_v22 = vld [vmem:[#allocation47_spill] sm:$0xff] }
 0x424   : > { %v4189_v2 = vpop.eup %4188 }
 0x425   : > { %v1755_v7 = vsub.f32 %v4216_v26, %v4189_v2  ;;  %v4191_v30 = vpop.eup %4190  ;;  %v5823_v26 = vld [vmem:[#allocation51_spill] sm:$0xff] }
 0x427   : > { %v1757_v35 = vmul.f32 %v4191_v30, %v1755_v7  ;;  %v5824_v7 = vld [vmem:[#allocation52_spill] sm:$0xff]  ;;  %v5825_v30 = vld [vmem:[#allocation53_spill] sm:$0xff] }
 0x428   : > { %v4193_v36 = vpop.eup %4192 }
 0x429   : > { %v5414_v47 = vadd.f32 %v4189_v2, %v1757_v35  ;;  %v1756_v48 = vsub.f32 %v5044_v49, %v4193_v36  ;;  %v4195_v55 = vpop.eup %4194  ;;  %v5822_v2 = vld [vmem:[#allocation50_spill] sm:$0xff] }
 0x42a   : > { %v5826_v35 = vld [vmem:[#allocation54_spill] sm:$0xff] }
 0x42b   : > { %3350 = vmatprep.mubr.f32.mxu0 %v5414_v47  ;;  %3385 = vmatprep.mubr.f32.mxu1 %v5414_v47  ;;  %v1758_v3 = vmul.f32 %v4195_v55, %v1756_v48  ;;  %v5828_v48 = vld [vmem:[#allocation56_spill] sm:$0xff]  ;;  %v5829_v55 = vld [vmem:[#allocation57_spill] sm:$0xff] }
 0x42d   : > { %v5419_v32 = vadd.f32 %v4193_v36, %v1758_v3  ;;  %v5827_v36 = vld [vmem:[#allocation55_spill] sm:$0xff]  ;;  %v5830_v3 = vld [vmem:[#allocation58_spill] sm:$0xff] }
 0x42f   : > { %3351 = vmatmul.mubr.f32.vlgmr.msra.gmra.mrb[10].mxu0 %v5419_v32  ;;  %3386 = vmatmul.mubr.f32.vlgmr.msra.gmra.mrb[10].mxu1 %v5419_v32 }
 0x430   : > { %3390 = vmatprep.mubr.msk.f32.mxu0 %vm4544_vm0, %v5771_v50  ;;  %3395 = vmatprep.mubr.msk.f32.mxu1 %vm4544_vm0, %v5771_v50 }
 0x502   : > { %v3352_v58 = vpop.f32.mrb[10].mxu0  ;;  %v3387_v49 = vpop.f32.mrb[10].mxu1 }
 0x503   : > { %v1833_v5 = vadd.f32 %v3352_v58, %v5058_v51  ;;  %v1827_v27 = vpop.f32.mrb[11].mxu0  ;;  %v1902_v38 = vpop.f32.mrb[11].mxu1  ;;  %v1908_v12 = vadd.f32 %v3387_v49, %v5063_v53  ;;  %v5831_v58 = vld [vmem:[#allocation59_spill] sm:$0xff]  ;;  %v5833_v49 = vld [vmem:[#allocation61_spill] sm:$0xff] }
 0x504   : > { %v1828_v1 = vadd.f32 %v5058_v51, %v1827_v27  ;;  %v1903_v8 = vadd.f32 %v5063_v53, %v1902_v38  ;;  %v5802_v51 = vld [vmem:[#allocation30_spill] sm:$0xff]  ;;  %v5803_v53 = vld [vmem:[#allocation31_spill] sm:$0xff]  ;;  %v5836_v27 = vld [vmem:[#allocation64_spill] sm:$0xff] }
 0x505   : > { %3394 = vmatpush3.msra.mxu1 %v1833_v5  ;;  %v5834_v5 = vld [vmem:[#allocation62_spill] sm:$0xff]  ;;  %v5837_v38 = vld [vmem:[#allocation65_spill] sm:$0xff] }
 0x506   : > { %3389 = vmatpush3.msra.mxu0 %v1828_v1  ;;  %3403 = vmatprep.subr.mxu1 %v5771_v50  ;;  %v5838_v1 = vld [vmem:[#allocation66_spill] sm:$0xff] }
 0x507   : > { %3391 = vmatmul.mubr.msk.f32.vlgmr.msra.gmra.mrb[12].mxu0 %vm934_vm1, %v5073_v62  ;;  %3396 = vmatmul.mubr.msk.f32.vlgmr.msra.gmra.mrb[12].mxu1 %vm934_vm1, %v5068_v57  ;;  %v5804_v57 = vld [vmem:[#allocation32_spill] sm:$0xff]  ;;  %v5805_v62 = vld [vmem:[#allocation33_spill] sm:$0xff] }
 0x508   : > { %3398 = vmatprep.subr.mxu0 %v5771_v50  ;;  %3404 = vmatpush3.msra.mxu1 %v1908_v12  ;;  %v5839_v12 = vld [vmem:[#allocation67_spill] sm:$0xff] }
 0x509   : > { %3399 = vmatpush3.msra.mxu0 %v1903_v8  ;;  %3400 = vmatprep.mubr.msk.f32.mxu0 %vm4544_vm0, %v5771_v50  ;;  %v5840_v8 = vld [vmem:[#allocation68_spill] sm:$0xff] }
 0x50a   : > { %3405 = vmatprep.mubr.msk.f32.mxu1 %vm4544_vm0, %v5771_v50  ;;  %3834 = vmatprep.subr.bf16.mxu0 %v5079_v6  ;;  %v5806_v6 = vld [vmem:[#allocation34_spill] sm:$0xff] }
 0x50b   : > { %3401 = vmatmul.mubr.msk.f32.vlgmr.msra.gmra.mrb[14].mxu0 %vm934_vm1, %v5087_v14  ;;  %3406 = vmatmul.mubr.msk.f32.vlgmr.msra.gmra.mrb[14].mxu1 %vm934_vm1, %v5091_v15  ;;  %v5807_v14 = vld [vmem:[#allocation36_spill] sm:$0xff]  ;;  %v5808_v15 = vld [vmem:[#allocation35_spill] sm:$0xff] }
 0x50c   : > { %3836 = vmatpush1.bf16.msra.mxu0 %v5093_v18  ;;  %3866 = vmatprep.subr.bf16.mxu1 %v5095_v19  ;;  %v5809_v18 = vld [vmem:[#allocation37_spill] sm:$0xff] }
 0x50d   : > { %3868 = vmatpush3.bf16.msra.mxu1 %v5095_v19  ;;  %3838 = vmatprep.subr.bf16.mxu0 %v5099_v20  ;;  %v5810_v19 = vld [vmem:[#allocation38_spill] sm:$0xff] }
 0x50e   : > { %3870 = vmatprep.subr.bf16.mxu1 %v5104_v25  ;;  %2255 = vmatprep.mubr.f32.mxu0 %v5771_v50 }
 0x510   : > { %3840 = vmatpush1.bf16.msra.mxu0 %v5112_v33 }
 0x511   : > { %3872 = vmatpush3.bf16.msra.mxu1 %v5104_v25  ;;  %3842 = vmatprep.subr.bf16.mxu0 %v5116_v34 }
 0x512   : > { %3874 = vmatprep.subr.bf16.mxu1 %v5119_v39 }
 0x514   : > { %3844 = vmatpush1.bf16.msra.mxu0 %v5123_v46 }
 0x515   : > { %3876 = vmatpush3.bf16.msra.mxu1 %v5119_v39  ;;  %3846 = vmatprep.subr.bf16.mxu0 %v5127_v52 }
 0x516   : > { %3878 = vmatprep.subr.bf16.mxu1 %v5130_v56 }
 0x518   : > { %3848 = vmatpush1.bf16.msra.mxu0 %v5133_v63  ;;  %v5811_v63 = vld [vmem:[#allocation39_spill] sm:$0xff] }
 0x519   : > { %3880 = vmatpush3.bf16.msra.mxu1 %v5130_v56  ;;  %3850 = vmatprep.subr.bf16.mxu0 %v5137_v0  ;;  %v5812_v0 = vld [vmem:[#allocation40_spill] sm:$0xff] }
 0x51a   : > { %3882 = vmatprep.subr.bf16.mxu1 %v5140_v4 }
 0x51c   : > { %3852 = vmatpush1.bf16.msra.mxu0 %v5143_v13  ;;  %v5814_v13 = vld [vmem:[#allocation42_spill] sm:$0xff] }
 0x51d   : > { %3884 = vmatpush3.bf16.msra.mxu1 %v5140_v4  ;;  %3854 = vmatprep.subr.bf16.mxu0 %v5147_v21  ;;  %v5813_v4 = vld [vmem:[#allocation41_spill] sm:$0xff]  ;;  %v5815_v21 = vld [vmem:[#allocation43_spill] sm:$0xff] }
 0x51e   : > { %3886 = vmatprep.subr.bf16.mxu1 %v5150_v28 }
 0x520   : > { %3856 = vmatpush1.bf16.msra.mxu0 %v5802_v51  ;;  %v5841_v51 = vld [vmem:[#allocation69_spill] sm:$0xff] }
 0x521   : > { %3888 = vmatpush3.bf16.msra.mxu1 %v5150_v28  ;;  %3858 = vmatprep.subr.bf16.mxu0 %v5803_v53  ;;  %v5816_v28 = vld [vmem:[#allocation44_spill] sm:$0xff]  ;;  %v5842_v53 = vld [vmem:[#allocation70_spill] sm:$0xff] }
 0x522   : > { %3890 = vmatprep.subr.bf16.mxu1 %v5804_v57 }
 0x524   : > { %3860 = vmatpush1.bf16.msra.mxu0 %v5805_v62 }
 0x525   : > { %3892 = vmatpush3.bf16.msra.mxu1 %v5804_v57  ;;  %3862 = vmatprep.subr.bf16.mxu0 %v5806_v6  ;;  %v5843_v57 = vld [vmem:[#allocation71_spill] sm:$0xff] }
 0x526   : > { %3894 = vmatprep.subr.bf16.mxu1 %v5807_v14 }
 0x528   : > { %3864 = vmatpush1.bf16.msra.mxu0 %v5808_v15 }
 0x529   : > { %3896 = vmatpush3.bf16.msra.mxu1 %v5807_v14  ;;  %3898 = vmatprep.subr.bf16.mxu0 %v5809_v18 }
 0x52a   : > { %3930 = vmatprep.subr.bf16.mxu1 %v5810_v19 }
 0x5da   : > { %v1977_v20 = vpop.f32.mrb[12].mxu0  ;;  %v2047_v25 = vpop.f32.mrb[12].mxu1 }
 0x5db   : > { %v3392_v33 = vpop.f32.mrb[13].mxu0  ;;  %v3397_v34 = vpop.f32.mrb[13].mxu1 }
 0x5de   : > { %v2117_v39 = vpop.f32.mrb[14].mxu0  ;;  %v2187_v46 = vpop.f32.mrb[14].mxu1 }
 0x5df   : > { %2256 = vmatmul.mubr.f32.vlgmr.msra.gmra.mrb[16].mxu0 %v2117_v39  ;;  %3440 = vmatprep.mubr.f32.mxu1 %v2117_v39  ;;  %v3402_v52 = vpop.f32.mrb[15].mxu0  ;;  %v3407_v56 = vpop.f32.mrb[15].mxu1 }
 0x5e0   : > { %3900 = vmatpush1.bf16.msra.mxu0 %v5811_v63  ;;  %3441 = vmatmul.mubr.f32.vlgmr.msra.gmra.mrb[16].mxu1 %v2187_v46 }
 0x5e1   : > { %3932 = vmatpush3.bf16.msra.mxu1 %v5810_v19  ;;  %3475 = vmatprep.mubr.f32.mxu1 %v1977_v20 }
 0x5e2   : > { %3902 = vmatprep.subr.bf16.mxu0 %v5812_v0  ;;  %3934 = vmatprep.subr.bf16.mxu1 %v5194_v10 }
 0x5e3   : > { %2261 = vmatprep.mubr.f32.mxu0 %v5771_v50 }
 0x5e4   : > { %3904 = vmatpush1.bf16.msra.mxu0 %v5813_v4 }
 0x5e5   : > { %3936 = vmatpush3.bf16.msra.mxu1 %v5194_v10  ;;  %3906 = vmatprep.subr.bf16.mxu0 %v5814_v13  ;;  %v5820_v10 = vld [vmem:[#allocation48_spill] sm:$0xff] }
 0x5e6   : > { %3938 = vmatprep.subr.bf16.mxu1 %v5815_v21  ;;  %2262 = vmatmul.mubr.f32.gmra.mrb[18].mxu0 %v2187_v46 }
 0x5e7   : > { %2407 = vmatprep.mubr.f32.mxu0 %v5771_v50 }
 0x5e8   : > { %3908 = vmatpush1.bf16.msra.mxu0 %v5816_v28 }
 0x5e9   : > { %3940 = vmatpush3.bf16.msra.mxu1 %v5815_v21  ;;  %3910 = vmatprep.subr.bf16.mxu0 %v5817_v17 }
 0x5ea   : > { %3942 = vmatprep.subr.bf16.mxu1 %v5818_v16 }
 0x5ec   : > { %3912 = vmatpush1.bf16.msra.mxu0 %v5819_v22 }
 0x5ed   : > { %3944 = vmatpush3.bf16.msra.mxu1 %v5818_v16  ;;  %3914 = vmatprep.subr.bf16.mxu0 %v5820_v10 }
 0x5ee   : > { %3946 = vmatprep.subr.bf16.mxu1 %v5821_v23 }
 0x5f0   : > { %3916 = vmatpush1.bf16.msra.mxu0 %v5822_v2 }
 0x5f1   : > { %3948 = vmatpush3.bf16.msra.mxu1 %v5821_v23  ;;  %3918 = vmatprep.subr.bf16.mxu0 %v5823_v26 }
 0x5f2   : > { %3950 = vmatprep.subr.bf16.mxu1 %v5237_v40 }
 0x5f4   : > { %3920 = vmatpush1.bf16.msra.mxu0 %v5824_v7 }
 0x5f5   : > { %3952 = vmatpush3.bf16.msra.mxu1 %v5237_v40  ;;  %3922 = vmatprep.subr.bf16.mxu0 %v5825_v30  ;;  %v5832_v40 = vld [vmem:[#allocation60_spill] sm:$0xff] }
 0x5f6   : > { %3954 = vmatprep.subr.bf16.mxu1 %v5826_v35 }
 0x5f8   : > { %3924 = vmatpush1.bf16.msra.mxu0 %v5827_v36 }
 0x5f9   : > { %3956 = vmatpush3.bf16.msra.mxu1 %v5826_v35  ;;  %3926 = vmatprep.subr.bf16.mxu0 %v5828_v48 }
 0x5fa   : > { %3958 = vmatprep.subr.bf16.mxu1 %v5257_v54 }
 0x5fc   : > { %3928 = vmatpush1.bf16.msra.mxu0 %v5829_v55 }
 0x5fd   : > { %3960 = vmatpush3.bf16.msra.mxu1 %v5257_v54  ;;  %3962 = vmatprep.subr.bf16.mxu0 %v5830_v3  ;;  %v5835_v54 = vld [vmem:[#allocation63_spill] sm:$0xff] }
 0x5fe   : > { %3994 = vmatprep.subr.bf16.mxu1 %v5831_v58 }
 0x5ff   : > { %2408 = vmatmul.mubr.f32.vlgmr.msra.gmra.mrb[16].mxu0 %v1977_v20 }
 0x600   : > { %3476 = vmatmul.mubr.f32.vlgmr.msra.gmra.mrb[16].mxu1 %v2047_v25  ;;  %3964 = vmatpush1.bf16.msra.mxu0 %v5832_v40 }
 0x601   : > { %3996 = vmatpush3.bf16.msra.mxu1 %v5831_v58  ;;  %3510 = vmatprep.mubr.f32.mxu1 %v5414_v47 }
 0x602   : > { %2413 = vmatprep.mubr.f32.mxu0 %v5771_v50  ;;  %3966 = vmatprep.subr.bf16.mxu0 %v5833_v49 }
 0x603   : > { %2414 = vmatmul.mubr.f32.gmra.mrb[18].mxu0 %v2047_v25  ;;  %3998 = vmatprep.subr.bf16.mxu1 %v5834_v5 }
 0x604   : > { %3968 = vmatpush1.bf16.msra.mxu0 %v5835_v54  ;;  %2565 = vmatprep.mubr.f32.mxu0 %v5771_v50 }
 0x605   : > { %4000 = vmatpush3.bf16.msra.mxu1 %v5834_v5  ;;  %3970 = vmatprep.subr.bf16.mxu0 %v5836_v27 }
 0x606   : > { %4002 = vmatprep.subr.bf16.mxu1 %v5837_v38 }
 0x608   : > { %3972 = vmatpush1.bf16.msra.mxu0 %v5838_v1 }
 0x609   : > { %4004 = vmatpush3.bf16.msra.mxu1 %v5837_v38  ;;  %3974 = vmatprep.subr.bf16.mxu0 %v5839_v12 }
 0x60a   : > { %4006 = vmatprep.subr.bf16.mxu1 %v5303_v31 }
 0x60c   : > { %3976 = vmatpush1.bf16.msra.mxu0 %v5840_v8 }
 0x60d   : > { %4008 = vmatpush3.bf16.msra.mxu1 %v5303_v31  ;;  %3978 = vmatprep.subr.bf16.mxu0 %v5841_v51 }
 0x60e   : > { %4010 = vmatprep.subr.bf16.mxu1 %v5313_v44 }
 0x610   : > { %3980 = vmatpush1.bf16.msra.mxu0 %v5842_v53 }
 0x611   : > { %4012 = vmatpush3.bf16.msra.mxu1 %v5313_v44  ;;  %3982 = vmatprep.subr.bf16.mxu0 %v5843_v57 }
 0x612   : > { %4014 = vmatprep.subr.bf16.mxu1 %v5323_v45 }
 0x614   : > { %3984 = vmatpush1.bf16.msra.mxu0 %v5326_v59 }
 0x615   : > { %4016 = vmatpush3.bf16.msra.mxu1 %v5323_v45  ;;  %3986 = vmatprep.subr.bf16.mxu0 %v5329_v9 }
 0x616   : > { %4018 = vmatprep.subr.bf16.mxu1 %v5333_v60 }
 0x618   : > { %3988 = vmatpush1.bf16.msra.mxu0 %v5336_v37 }
 0x619   : > { %4020 = vmatpush3.bf16.msra.mxu1 %v5333_v60  ;;  %3990 = vmatprep.subr.bf16.mxu0 %v5339_v11 }
 0x61a   : > { %4022 = vmatprep.subr.bf16.mxu1 %v5343_v24 }
 0x61c   : > { %3992 = vmatpush1.bf16.msra.mxu0 %v5346_v61 }
 0x61d   : > { %4024 = vmatpush3.bf16.msra.mxu1 %v5343_v24 }
 0x61f   : > { %2566 = vmatmul.mubr.f32.vlgmr.msra.gmra.mrb[16].mxu0 %v5414_v47 }
 0x620   : > { %3511 = vmatmul.mubr.f32.vlgmr.msra.gmra.mrb[18].mxu1 %v5419_v32  ;;  %2571 = vmatprep.mubr.f32.mxu0 %v5771_v50 }
 0x623   : > { %2572 = vmatmul.mubr.f32.gmra.mrb[18].mxu0 %v5419_v32 }
 0x6d3   : > { %v3477_v31 = vpop.f32.mrb[16].mxu1 }
 0x6d4   : > { %v2486_v44 = vpop.f32.mrb[17].mxu1  ;;  %v2500_v13 = vadd.f32 %v3477_v31, %v5407_v42 }
 0x6d5   : > { %v2497_v46 = vadd.f32 %v2486_v44, %v5407_v42 }
 0x6f2   : > { %v2567_v45 = vpop.f32.mrb[16].mxu0 }
 0x6f3   : > { %v4034_v59 = vadd.f32 %v5397_v29, %v2567_v45  ;;  %v2569_v9 = vpop.f32.mrb[17].mxu0  ;;  %v3512_v60 = vpop.f32.mrb[18].mxu1 }
 0x6f4   : > { %v2644_v37 = vpop.f32.mrb[19].mxu1  ;;  %v4036_v14 = vadd.f32 %v5400_v43, %v2569_v9 }
 0x6f5   : > { %v2914_v11 = vmul.f32 -1.442695, %v4034_v59 }
 0x6f6   : > { %v2573_v61 = vpop.f32.mrb[18].mxu0  ;;  %v2916_v50 = vmul.f32 -1.442695, %v4036_v14 }
 0x6f7   : > { %4196 = vpow2.f32 %v2914_v11  ;;  %v4038_v24 = vadd.f32 %v5397_v29, %v2573_v61  ;;  %v2575_v62 = vpop.f32.mrb[19].mxu0  ;;  %v2645_v29 = vadd.f32 %v2644_v37, %v5405_v41 }
 0x6f8   : > { %v4040_v15 = vadd.f32 %v5400_v43, %v2575_v62  ;;  %v2650_v43 = vadd.f32 %v3512_v60, %v5405_v41 }
 0x6f9   : > { %v2915_v6 = vmul.f32 -1.442695, %v4038_v24 }
 0x6fa   : > { %v2917_v20 = vmul.f32 -1.442695, %v4040_v15 }
 0x6fb   : > { %4198 = vpow2.f32 %v2915_v6 }
 0x6fc   : > { %4200 = vpow2.f32 %v2916_v50 }
 0x701   : > { %v4197_v18 = vpop.eup %4196 }
 0x702   : > { %v2661_v19 = vadd.f32 1.0, %v4197_v18 }
 0x704   : > { %4202 = vrcp.f32 %v2661_v19 }
 0x705   : > { %v4199_v25 = vpop.eup %4198  ;;  %4204 = vpow2.f32 %v2917_v20 }
 0x706   : > { %v2662_v33 = vadd.f32 1.0, %v4199_v25  ;;  %v4201_v34 = vpop.eup %4200 }
 0x707   : > { %v2675_v63 = vadd.f32 1.0, %v4201_v34 }
 0x708   : > { %4206 = vrcp.f32 %v2662_v33 }
 0x70e   : > { %v4203_v39 = vpop.eup %4202 }
 0x70f   : > { %v2681_v52 = vmul.f32 %v4203_v39, %v2645_v29  ;;  %v4205_v56 = vpop.eup %4204 }
 0x710   : > { %v2676_v17 = vadd.f32 1.0, %v4205_v56 }
 0x711   : > { %v2683_v0 = vadd.f32 %v2681_v52, %v2497_v46 }
 0x712   : > { %v4207_v4 = vpop.eup %4206 }
 0x713   : > { %4208 = vtanh.f32 %v2683_v0  ;;  %v2682_v21 = vmul.f32 %v4207_v4, %v2650_v43 }
 0x714   : > { %4210 = vrcp.f32 %v2675_v63 }
 0x715   : > { %v2684_v28 = vadd.f32 %v2682_v21, %v2500_v13 }
 0x717   : > { %4212 = vtanh.f32 %v2684_v28 }
 0x718   : > { %4214 = vrcp.f32 %v2676_v17 }
 0x71d   : > { %v4209_v16 = vpop.eup %4208 }
 0x71e   : > { %v2687_v22 = vsub.f32 %v5414_v47, %v4209_v16  ;;  %v4211_v10 = vpop.eup %4210 }
 0x720   : > { %v2689_v23 = vmul.f32 %v4211_v10, %v2687_v22 }
 0x721   : > { %v4213_v41 = vpop.eup %4212 }
 0x722   : > { %v2691_v2 = vadd.f32 %v4209_v16, %v2689_v23  ;;  %v2688_v26 = vsub.f32 %v5419_v32, %v4213_v41  ;;  %v4215_v42 = vpop.eup %4214 }
 0x724   : > { %v2690_v7 = vmul.f32 %v4215_v42, %v2688_v26  ;;  %2693 = vst [vmem:[%s581_s17] sm:$0xff] %v2691_v2 }
 0x726   : > { %v2692_v47 = vadd.f32 %v4213_v41, %v2690_v7 }
 0x728   : > { %2694 = vst [vmem:[%s581_s17 + $0x8] sm:$0xff] %v2692_v47 }
 0x729   : > { %4460 = shalt.err (!%p4457_p0)
}
 0x72a   : > { %s4461_s21 = scalar_lea.hbm %s5566_s1, 256  ;;  %s4465_s7 = scalar_lea.hbm %s5846_s25, 512 }
 0x72b   : > { %p4462_p12 = scmp.ne.s32.totalorder %s5566_s1, %s4461_s21  ;;  %p4466_p6 = scmp.lt.u32.totalorder %s5566_s1, %s5846_s25 }
 0x72c   : > { %p4467_p8 = scmp.lt.u32.totalorder %s4465_s7, %s4461_s21  ;;  %p4469_p2 = scmp.lt.u32.totalorder %s4461_s21, %s5566_s1 }
 0x72d   : > { %p4463_p11 = pnand %p4462_p12, %p5847_p9 }
 0x72e   : > { %p4468_p7 = por %p4467_p8, %p4466_p6 }
 0x72f   : > { %p4464_p13 = pneg %p4463_p11 }
 0x730   : > { %p4470_p3 = por %p4469_p2, %p4468_p7 }
 0x732   : > { %p4471_p10 = pnand %p4470_p3, %p4464_p13 }
 0x734   : > { %4474 = shalt.err (!%p4471_p10)
}
 0x735   : > { %s4546_s15 = smov 128   ;;  %s4547_s19 = smov 8  }
 0x736   : > { %4087 = dma.vmem_to_hbm [thread:$0]  (%p5847_p9), %s5568_s20, 256, %s5566_s1, %s2696_s30, %s4546_s15, %s4546_s15, %s4547_s19  }
 0x737 PF: > { %s5848_s12 = sld [smem:[#allocation23_spill]]  ;;  %s5849_s6 = sld [smem:[#allocation29_spill]] }
 0x738   : > { %s5850_s17 = sld [smem:[#allocation24_spill]] }
 0x73d   : > { %s2724_s11 = sand.u32 1, %s5848_s12   ;;  %p5851_p1 = scmp.ne.s32.totalorder %s5849_s6, 0 }
 0x73e   : > { %p5852_p5 = scmp.ge.s32.totalorder %s5850_s17, 2  ;;  %s2725_s28 = scalar_lea.sflag [#allocation4], %s2724_s11 }
 0x740   : > { %p4116_p4 = pnand %p5852_p5, %p5851_p1 }
 0x742   : > { %4512 = dma.done.wait (!%p4116_p4), %s2725_s28, 256  }
 0x743   : > { %4514 = vsyncadd (!%p4116_p4), %s2725_s28, 4294967040  ;;  %s5853_s24 = sld [smem:[#allocation26_spill]]  ;;  %s5854_s13 = sld [smem:[#allocation28_spill]] }
 0x744   : > { %s5855_s21 = smov %s4521_s22  ;;  %s5856_s22 = smov %s4525_s23 }
 0x749   : > { %p31_p0 = scmp.ge.s32.totalorder %s5853_s24, 4   ;;  %s5857_s23 = smov %s5854_s13 }
 0x74b   :  { %33 = sbr.rel (!%p31_p0) target bundleno = 19 (0x13), region = 157 }
 0x752   :  { %2730 = vsyncpa [#allocation3], 1 }
 0x753   :  { %2732 = vsyncpa [#allocation3 + $0x1], 1 }
 0x754   :  { %2733 = vsyncpa [#allocation6], 1 }
 0x755   :  { %2735 = vsyncpa [#allocation6 + $0x1], 1 }
 0x756   :  { %2736 = vsyncpa [#allocation9], 1 }
 0x757   :  { %2737 = vsyncpa [#allocation12], 1 }
 0x758   :  { %2738 = vsyncpa [#allocation15], 1 }
 0x759   :  { %2739 = vsyncpa [#allocation4], 1 }
 0x75a   :  { %2741 = vsyncpa [#allocation4 + $0x1], 1 }

</bundles_post_ra>
